<compile_context>
chip_gen: v5e
topology: v5e:2x2
jax: 0.10.0
libtpu: 0.0.40
codegen_flags: <defaults>
</compile_context>

<pallas_src>
import functools
import math

import jax
import jax.numpy as jnp
from jax.experimental import pallas as pl
from jax.experimental.pallas import tpu as pltpu

# ----------------------------- model config ---------------------------------
EMBED_DIM = 32        # embed_dim
FF_DIM = 64           # ff_dim
MAX_LEN = 8           # max_len (== sequence length here)
NUM_HEADS = 2         # num_heads
HEAD_DIM = EMBED_DIM // NUM_HEADS
HIDDEN = 32           # dense1 output
NUM_CLASSES = 2       # dense2 output
LN_EPS = 1e-5
SCALE = 1.0 / math.sqrt(HEAD_DIM)

DEFAULT_BLOCK_B = 512  # requested batch tile (rows per grid step)

# weights that feed the MXU -> cast to bf16 once in the wrapper
_BF16_WEIGHTS = frozenset({"wqkv", "wo", "w1", "w2", "d1w", "d2w"})


def _round_up(a, m):
    return ((a + m - 1) // m) * m


def _vmem_capacity_bytes():
    """Per-generation VMEM capacity; conservative (v7x-sized) fallback."""
    try:
        return int(pltpu.get_tpu_info().vmem_capacity_bytes)
    except Exception:
        return 64 << 20


def _pick_block_b(batch, requested):
    """Batch-tile selection: big enough to amortize per-step overhead, small
    enough for the chip's VMEM, and split so >=2 grid steps exist when the
    batch is large (v7x has 2 TensorCores sharding the 'parallel' axis)."""
    vmem = _vmem_capacity_bytes()
    # ~40-64 KiB of live, lane-padded f32 activations per batch row.
    gen_cap = 256 if vmem <= (64 << 20) else 512
    bb = min(requested, gen_cap, _round_up(batch, 8))
    if batch >= 128 and _round_up(batch, 8) <= bb:
        # whole batch would fit one step -> halve the tile for 2 parallel steps
        bb = _round_up(-(-batch // 2), 8)
    return max(bb, 8)


def _layernorm(x, gamma, beta):
    mean = jnp.mean(x, axis=-1, keepdims=True)
    var = jnp.mean((x - mean) ** 2, axis=-1, keepdims=True)
    return (x - mean) * jax.lax.rsqrt(var + LN_EPS) * gamma + beta


def _softmax_last(x, *, approx):
    x = x - jnp.max(x, axis=-1, keepdims=True)
    e = jnp.exp(x)
    s = jnp.sum(e, axis=-1, keepdims=True)
    if approx:
        # divide -> EUP reciprocal (free slot); used for the attention softmax
        return e * pl.reciprocal(s, approx=True)
    return e / s


# --------------------------------- kernel -----------------------------------
def transformer_classifier_kernel(
    x_ref, pos_ref,
    wqkv_ref, bqkv_ref, wo_ref, bo_ref,
    g1_ref, be1_ref,
    w1_ref, b1_ref, w2_ref, b2_ref,
    g2_ref, be2_ref,
    d1w_ref, d1b_ref, d2w_ref, d2b_ref,
    out_ref,
    *, block_b,
):
    S, E, Dh = MAX_LEN, EMBED_DIM, HEAD_DIM
    bf16 = jnp.bfloat16

    # ---- PositionEmbedding: x + pos_emb[:S] (f32, broadcast over batch tile) ----
    x = x_ref[...] + pos_ref[...]                      # (BB, S, E)
    # Free reshape: S == 8 matches the f32 sublane tile exactly.
    x2 = x.reshape(block_b * S, E)                     # (BB*S, E)

    # ---- fused QKV projection: one (BB*S, E) @ (E, 3E) bf16 matmul, f32 acc ----
    # 1/sqrt(head_dim) is pre-folded into the Q columns of wqkv / bqkv.
    qkv = jnp.dot(x2.astype(bf16), wqkv_ref[...],
                  preferred_element_type=jnp.float32) + bqkv_ref[...]   # (BB*S, 3E) f32

    # ---- multi-head self-attention: static 2-head unroll, no concat ----
    # Heads are sliced straight out of qkv (one lane sub-select each), reshaped
    # to 3-D exactly once, and the output projection is done per head against
    # row blocks of W_o (replaces concat + single matmul -> no lane concat).
    attn_out = bo_ref[...]                             # (1, E), broadcasts
    for h in range(NUM_HEADS):
        lo = h * Dh
        qh = qkv[:, 0 * E + lo:0 * E + lo + Dh].reshape(block_b, S, Dh)
        kh = qkv[:, 1 * E + lo:1 * E + lo + Dh].reshape(block_b, S, Dh)
        vh = qkv[:, 2 * E + lo:2 * E + lo + Dh].reshape(block_b, S, Dh)
        scores = jnp.einsum('bqd,bkd->bqk', qh.astype(bf16), kh.astype(bf16),
                            preferred_element_type=jnp.float32)        # (BB, S, S)
        p = _softmax_last(scores, approx=True)                         # f32
        ctx_h = jnp.einsum('bqk,bkd->bqd', p.astype(bf16), vh.astype(bf16),
                           preferred_element_type=jnp.float32)         # (BB, S, Dh)
        attn_out = attn_out + jnp.dot(
            ctx_h.reshape(block_b * S, Dh).astype(bf16),
            wo_ref[lo:lo + Dh, :],                                     # (Dh, E) bf16
            preferred_element_type=jnp.float32)

    # dropout -> identity (eval mode); post-LN encoder layer (f32)
    y = _layernorm(x2 + attn_out, g1_ref[...], be1_ref[...])           # norm1

    # ---- feed-forward (bf16 matmuls, f32 accumulate / elementwise) ----
    f = jnp.dot(y.astype(bf16), w1_ref[...],
                preferred_element_type=jnp.float32) + b1_ref[...]
    f = jnp.maximum(f, 0.0)                                            # relu
    f = jnp.dot(f.astype(bf16), w2_ref[...],
                preferred_element_type=jnp.float32) + b2_ref[...]
    z = _layernorm(y + f, g2_ref[...], be2_ref[...])                   # norm2

    # ---- global average pooling over the sequence (AdaptiveAvgPool1d(1)) ----
    pooled = jnp.mean(z.reshape(block_b, S, E), axis=1)                # (BB, E)

    # ---- classification head ----
    h1 = jnp.dot(pooled.astype(bf16), d1w_ref[...],
                 preferred_element_type=jnp.float32) + d1b_ref[...]
    h1 = jnp.maximum(h1, 0.0)                                          # relu
    logits = jnp.dot(h1.astype(bf16), d2w_ref[...],
                     preferred_element_type=jnp.float32) + d2b_ref[...]
    probs = _softmax_last(logits, approx=False)                        # (BB, 2), exact

    # one full-tile store per grid step
    out_ref[...] = probs.astype(out_ref.dtype)


# -------------------------------- wrapper ------------------------------------
def transformer_classifier(x, params, *, block_b=DEFAULT_BLOCK_B):
    B, S, E = x.shape
    assert S == MAX_LEN and E == EMBED_DIM

    bb = _pick_block_b(B, block_b)
    b_pad = _round_up(B, bb)
    if b_pad != B:
        x = jnp.pad(x, ((0, b_pad - B), (0, 0), (0, 0)))

    weight_names = [
        "pos",
        "wqkv", "bqkv", "wo", "bo",
        "g1", "be1",
        "w1", "b1", "w2", "b2",
        "g2", "be2",
        "d1w", "d1b", "d2w", "d2b",
    ]
    # Matmul weights are cast to bf16 once here; biases / LN params / pos stay f32.
    weights = [
        params[n].astype(jnp.bfloat16) if n in _BF16_WEIGHTS else params[n]
        for n in weight_names
    ]

    def full_spec(w):
        n = w.ndim
        return pl.BlockSpec(w.shape, lambda i, n=n: (0,) * n)

    in_specs = [pl.BlockSpec((bb, S, E), lambda i: (i, 0, 0))]
    in_specs += [full_spec(w) for w in weights]

    # VMEM budget: ~2x the per-tile live working set, clamped to the chip.
    vmem = _vmem_capacity_bytes()
    vmem_limit = int(min(0.8 * vmem, max(32 << 20, 2 * bb * 64 * 1024)))

    # Advisory cost estimate for the XLA scheduler.
    flops_per_row = (
        2 * S * E * 3 * E                         # fused QKV
        + NUM_HEADS * 2 * (2 * S * S * HEAD_DIM)  # scores + context
        + 2 * S * E * E                           # output projection
        + 2 * (2 * S * E * FF_DIM)                # FF1 + FF2
        + 2 * E * HIDDEN + 2 * HIDDEN * NUM_CLASSES
    )
    weights_bytes = sum(int(w.size) * w.dtype.itemsize for w in weights)
    cost = pl.CostEstimate(
        flops=b_pad * flops_per_row,
        transcendentals=b_pad * (NUM_HEADS * S * S + 2 * S + NUM_CLASSES),
        bytes_accessed=int(x.size) * x.dtype.itemsize
        + b_pad * NUM_CLASSES * 4
        + weights_bytes,
    )

    out = pl.pallas_call(
        functools.partial(transformer_classifier_kernel, block_b=bb),
        out_shape=jax.ShapeDtypeStruct((b_pad, NUM_CLASSES), jnp.float32),
        grid_spec=pltpu.PrefetchScalarGridSpec(
            num_scalar_prefetch=0,
            grid=(b_pad // bb,),
            in_specs=in_specs,
            # blocked per batch tile -> each grid step owns its own output slab
            out_specs=pl.BlockSpec((bb, NUM_CLASSES), lambda i: (i, 0)),
        ),
        compiler_params=pltpu.CompilerParams(
            dimension_semantics=("parallel",),
            vmem_limit_bytes=vmem_limit,
        ),
        cost_estimate=cost,
    )(x, *weights)
    return out[:B]


# ----------------------- parameters & pure-JAX reference ---------------------
def init_params(key):
    """Deterministic synthetic parameters matching the PyTorch module shapes."""
    keys = jax.random.split(key, 16)

    def rnd(k, shape, scale=0.05):
        return (scale * jax.random.normal(k, shape)).astype(jnp.float32)

    # nn.MultiheadAttention: in_proj_weight (3E, E); split, transpose, fuse into
    # one (E, 3E) weight. The attention scale 1/sqrt(head_dim) is folded into
    # the Q columns / Q bias segment (exact transform).
    in_proj_w = rnd(keys[0], (3 * EMBED_DIM, EMBED_DIM))
    in_proj_b = rnd(keys[1], (3 * EMBED_DIM,))
    wq = in_proj_w[0 * EMBED_DIM:1 * EMBED_DIM].T * SCALE
    wk = in_proj_w[1 * EMBED_DIM:2 * EMBED_DIM].T
    wv = in_proj_w[2 * EMBED_DIM:3 * EMBED_DIM].T
    bq = in_proj_b[0 * EMBED_DIM:1 * EMBED_DIM] * SCALE
    bk = in_proj_b[1 * EMBED_DIM:2 * EMBED_DIM]
    bv = in_proj_b[2 * EMBED_DIM:3 * EMBED_DIM]
    wqkv = jnp.concatenate([wq, wk, wv], axis=1)                  # (E, 3E)
    bqkv = jnp.concatenate([bq, bk, bv]).reshape(1, 3 * EMBED_DIM)

    params = dict(
        pos=rnd(keys[2], (MAX_LEN, EMBED_DIM)),                   # PositionEmbedding table
        wqkv=wqkv, bqkv=bqkv,
        wo=rnd(keys[3], (EMBED_DIM, EMBED_DIM)).T,                # out_proj.weight^T
        bo=rnd(keys[4], (EMBED_DIM,)).reshape(1, EMBED_DIM),
        g1=jnp.ones((1, EMBED_DIM), jnp.float32),                 # norm1
        be1=jnp.zeros((1, EMBED_DIM), jnp.float32),
        w1=rnd(keys[5], (FF_DIM, EMBED_DIM)).T,                   # linear1.weight^T -> (E, FF)
        b1=rnd(keys[6], (FF_DIM,)).reshape(1, FF_DIM),
        w2=rnd(keys[7], (EMBED_DIM, FF_DIM)).T,                   # linear2.weight^T -> (FF, E)
        b2=rnd(keys[8], (EMBED_DIM,)).reshape(1, EMBED_DIM),
        g2=jnp.ones((1, EMBED_DIM), jnp.float32),                 # norm2
        be2=jnp.zeros((1, EMBED_DIM), jnp.float32),
        d1w=rnd(keys[9], (HIDDEN, EMBED_DIM)).T,                  # dense1.weight^T -> (E, 32)
        d1b=rnd(keys[10], (HIDDEN,)).reshape(1, HIDDEN),
        d2w=rnd(keys[11], (NUM_CLASSES, HIDDEN)).T,               # dense2.weight^T -> (32, 2)
        d2b=rnd(keys[12], (NUM_CLASSES,)).reshape(1, NUM_CLASSES),
    )
    return params


def reference_forward(x, params):
    """Pure-JAX reference of the same forward pass (bf16 matmul operands with
    f32 accumulation, matching the kernel's numerics). SCALE is already folded
    into the Q weights, so no explicit q-scaling here."""
    bf16 = jnp.bfloat16
    B, S, E = x.shape
    Dh = HEAD_DIM
    x2 = (x + params["pos"][None]).reshape(B * S, E)
    qkv = jnp.dot(x2.astype(bf16), params["wqkv"].astype(bf16),
                  preferred_element_type=jnp.float32) + params["bqkv"]

    attn_out = params["bo"]
    for h in range(NUM_HEADS):
        lo = h * Dh
        qh = qkv[:, 0 * E + lo:0 * E + lo + Dh].reshape(B, S, Dh)
        kh = qkv[:, 1 * E + lo:1 * E + lo + Dh].reshape(B, S, Dh)
        vh = qkv[:, 2 * E + lo:2 * E + lo + Dh].reshape(B, S, Dh)
        s = jnp.einsum('bqd,bkd->bqk', qh.astype(bf16), kh.astype(bf16),
                       preferred_element_type=jnp.float32)
        p = jax.nn.softmax(s, axis=-1)
        ctx = jnp.einsum('bqk,bkd->bqd', p.astype(bf16), vh.astype(bf16),
                         preferred_element_type=jnp.float32).reshape(B * S, Dh)
        attn_out = attn_out + jnp.dot(ctx.astype(bf16),
                                      params["wo"][lo:lo + Dh].astype(bf16),
                                      preferred_element_type=jnp.float32)

    def ln(a, g, b):
        m = a.mean(-1, keepdims=True)
        var = ((a - m) ** 2).mean(-1, keepdims=True)
        return (a - m) * jax.lax.rsqrt(var + LN_EPS) * g + b

    y = ln(x2 + attn_out, params["g1"], params["be1"])
    f = jnp.maximum(jnp.dot(y.astype(bf16), params["w1"].astype(bf16),
                            preferred_element_type=jnp.float32) + params["b1"], 0.0)
    f = jnp.dot(f.astype(bf16), params["w2"].astype(bf16),
                preferred_element_type=jnp.float32) + params["b2"]
    z = ln(y + f, params["g2"], params["be2"])
    pooled = z.reshape(B, S, E).mean(axis=1)
    h1 = jnp.maximum(jnp.dot(pooled.astype(bf16), params["d1w"].astype(bf16),
                             preferred_element_type=jnp.float32) + params["d1b"], 0.0)
    logits = jnp.dot(h1.astype(bf16), params["d2w"].astype(bf16),
                     preferred_element_type=jnp.float32) + params["d2b"]
    return jax.nn.softmax(logits, axis=-1)


if __name__ == "__main__":
    key = jax.random.PRNGKey(0)
    k_x, k_p = jax.random.split(key)

    B = 2
    x = jax.random.normal(k_x, (B, MAX_LEN, EMBED_DIM), dtype=jnp.float32)
    params = init_params(k_p)

    out = jax.block_until_ready(transformer_classifier(x, params))
    assert out.shape == (B, NUM_CLASSES)

    # probabilities sum to 1 per row and match the pure-JAX reference
    assert bool(jnp.allclose(jnp.sum(out, axis=-1), 1.0, atol=1e-5))
    ref = reference_forward(x, params)
    assert bool(jnp.allclose(out, ref, atol=5e-3, rtol=2e-2)), (out, ref)
    print("KERNEL_OK")
</pallas_src>

<mosaic_0001>
module attributes {stable_mosaic.version = 11 : i64} {
  func.func @transformer_classifier_kernel(%arg0: i32, %arg1: memref<8x8x32xf32, #tpu.memory_space<vmem>>, %arg2: memref<8x32xf32, #tpu.memory_space<vmem>>, %arg3: memref<32x96xbf16, #tpu.memory_space<vmem>>, %arg4: memref<1x96xf32, #tpu.memory_space<vmem>>, %arg5: memref<32x32xbf16, #tpu.memory_space<vmem>>, %arg6: memref<1x32xf32, #tpu.memory_space<vmem>>, %arg7: memref<1x32xf32, #tpu.memory_space<vmem>>, %arg8: memref<1x32xf32, #tpu.memory_space<vmem>>, %arg9: memref<32x64xbf16, #tpu.memory_space<vmem>>, %arg10: memref<1x64xf32, #tpu.memory_space<vmem>>, %arg11: memref<64x32xbf16, #tpu.memory_space<vmem>>, %arg12: memref<1x32xf32, #tpu.memory_space<vmem>>, %arg13: memref<1x32xf32, #tpu.memory_space<vmem>>, %arg14: memref<1x32xf32, #tpu.memory_space<vmem>>, %arg15: memref<32x32xbf16, #tpu.memory_space<vmem>>, %arg16: memref<1x32xf32, #tpu.memory_space<vmem>>, %arg17: memref<32x2xbf16, #tpu.memory_space<vmem>>, %arg18: memref<1x2xf32, #tpu.memory_space<vmem>>, %arg19: memref<8x2xf32, #tpu.memory_space<vmem>>) attributes {dimension_semantics = [#tpu.dimension_semantics<parallel>], iteration_bounds = array<i64: 1>, scalar_prefetch = 0 : i64, scratch_operands = 0 : i64, tpu.core_type = #tpu.core_type<tc>, window_params = [{transform_indices = @transform_0, window_bounds = array<i64: 8, 8, 32>}, {pipeline_mode = #tpu.pipeline_mode<synchronous>, transform_indices = @transform_1, window_bounds = array<i64: 8, 32>}, {pipeline_mode = #tpu.pipeline_mode<synchronous>, transform_indices = @transform_2, window_bounds = array<i64: 32, 96>}, {pipeline_mode = #tpu.pipeline_mode<synchronous>, transform_indices = @transform_3, window_bounds = array<i64: 1, 96>}, {pipeline_mode = #tpu.pipeline_mode<synchronous>, transform_indices = @transform_4, window_bounds = array<i64: 32, 32>}, {pipeline_mode = #tpu.pipeline_mode<synchronous>, transform_indices = @transform_5, window_bounds = array<i64: 1, 32>}, {pipeline_mode = #tpu.pipeline_mode<synchronous>, transform_indices = @transform_6, window_bounds = array<i64: 1, 32>}, {pipeline_mode = #tpu.pipeline_mode<synchronous>, transform_indices = @transform_7, window_bounds = array<i64: 1, 32>}, {pipeline_mode = #tpu.pipeline_mode<synchronous>, transform_indices = @transform_8, window_bounds = array<i64: 32, 64>}, {pipeline_mode = #tpu.pipeline_mode<synchronous>, transform_indices = @transform_9, window_bounds = array<i64: 1, 64>}, {pipeline_mode = #tpu.pipeline_mode<synchronous>, transform_indices = @transform_10, window_bounds = array<i64: 64, 32>}, {pipeline_mode = #tpu.pipeline_mode<synchronous>, transform_indices = @transform_11, window_bounds = array<i64: 1, 32>}, {pipeline_mode = #tpu.pipeline_mode<synchronous>, transform_indices = @transform_12, window_bounds = array<i64: 1, 32>}, {pipeline_mode = #tpu.pipeline_mode<synchronous>, transform_indices = @transform_13, window_bounds = array<i64: 1, 32>}, {pipeline_mode = #tpu.pipeline_mode<synchronous>, transform_indices = @transform_14, window_bounds = array<i64: 32, 32>}, {pipeline_mode = #tpu.pipeline_mode<synchronous>, transform_indices = @transform_15, window_bounds = array<i64: 1, 32>}, {pipeline_mode = #tpu.pipeline_mode<synchronous>, transform_indices = @transform_16, window_bounds = array<i64: 32, 2>}, {pipeline_mode = #tpu.pipeline_mode<synchronous>, transform_indices = @transform_17, window_bounds = array<i64: 1, 2>}, {transform_indices = @transform_18, window_bounds = array<i64: 8, 2>}]} {
    %c0 = arith.constant 0 : index
    %c0_0 = arith.constant 0 : index
    %c0_1 = arith.constant 0 : index
    %0 = vector.load %arg1[%c0, %c0_0, %c0_1] : memref<8x8x32xf32, #tpu.memory_space<vmem>>, vector<8x8x32xf32>
    %c0_2 = arith.constant 0 : index
    %c0_3 = arith.constant 0 : index
    %1 = vector.load %arg2[%c0_2, %c0_3] : memref<8x32xf32, #tpu.memory_space<vmem>>, vector<8x32xf32>
    %2 = vector.shape_cast %1 : vector<8x32xf32> to vector<1x8x32xf32>
    %3 = vector.broadcast %2 : vector<1x8x32xf32> to vector<8x8x32xf32>
    %4 = arith.addf %0, %3 : vector<8x8x32xf32>
    %5 = vector.shape_cast %4 : vector<8x8x32xf32> to vector<64x32xf32>
    %6 = arith.truncf %5 : vector<64x32xf32> to vector<64x32xbf16>
    %c0_4 = arith.constant 0 : index
    %c0_5 = arith.constant 0 : index
    %7 = vector.load %arg3[%c0_4, %c0_5] : memref<32x96xbf16, #tpu.memory_space<vmem>>, vector<32x96xbf16>
    %cst = arith.constant dense<0.000000e+00> : vector<64x96xf32>
    %8 = tpu.matmul %6, %7, %cst {dimension_numbers = #tpu.dot_dimension_numbers<[1], [0], [0], [1], [0, 0, 1, 1], [], []>} : vector<64x32xbf16>, vector<32x96xbf16>, vector<64x96xf32> -> vector<64x96xf32>
    %c0_6 = arith.constant 0 : index
    %c0_7 = arith.constant 0 : index
    %9 = vector.load %arg4[%c0_6, %c0_7] : memref<1x96xf32, #tpu.memory_space<vmem>>, vector<1x96xf32>
    %10 = vector.broadcast %9 : vector<1x96xf32> to vector<64x96xf32>
    %11 = arith.addf %8, %10 : vector<64x96xf32>
    %c0_8 = arith.constant 0 : index
    %c0_9 = arith.constant 0 : index
    %12 = vector.load %arg6[%c0_8, %c0_9] : memref<1x32xf32, #tpu.memory_space<vmem>>, vector<1x32xf32>
    %13 = vector.extract_strided_slice %11 {offsets = [0, 0], sizes = [64, 16], strides = [1, 1]} : vector<64x96xf32> to vector<64x16xf32>
    %14 = vector.shape_cast %13 : vector<64x16xf32> to vector<8x8x16xf32>
    %15 = vector.extract_strided_slice %11 {offsets = [0, 32], sizes = [64, 16], strides = [1, 1]} : vector<64x96xf32> to vector<64x16xf32>
    %16 = vector.shape_cast %15 : vector<64x16xf32> to vector<8x8x16xf32>
    %17 = vector.extract_strided_slice %11 {offsets = [0, 64], sizes = [64, 16], strides = [1, 1]} : vector<64x96xf32> to vector<64x16xf32>
    %18 = vector.shape_cast %17 : vector<64x16xf32> to vector<8x8x16xf32>
    %19 = arith.truncf %14 : vector<8x8x16xf32> to vector<8x8x16xbf16>
    %20 = arith.truncf %16 : vector<8x8x16xf32> to vector<8x8x16xbf16>
    "tpu.trace_start"() <{level = 10 : i32, message = "bqd,bkd->bqk"}> : () -> ()
    %cst_10 = arith.constant dense<0.000000e+00> : vector<8x8x8xf32>
    %21 = tpu.matmul %19, %20, %cst_10 {dimension_numbers = #tpu.dot_dimension_numbers<[2], [2], [1], [1], [0, 0, 0, 1, 1, 1], [0], [0]>} : vector<8x8x16xbf16>, vector<8x8x16xbf16>, vector<8x8x8xf32> -> vector<8x8x8xf32>
    "tpu.trace_stop"() : () -> ()
    %cst_11 = arith.constant dense<0xFF800000> : vector<8x8xf32>
    %22 = vector.multi_reduction <maximumf>, %21, %cst_11 [2] : vector<8x8x8xf32> to vector<8x8xf32>
    %23 = vector.shape_cast %22 : vector<8x8xf32> to vector<8x8x1xf32>
    %24 = vector.broadcast %23 : vector<8x8x1xf32> to vector<8x8x8xf32>
    %25 = arith.subf %21, %24 : vector<8x8x8xf32>
    %26 = math.exp %25 : vector<8x8x8xf32>
    %cst_12 = arith.constant dense<0.000000e+00> : vector<8x8xf32>
    %27 = vector.multi_reduction <add>, %26, %cst_12 [2] : vector<8x8x8xf32> to vector<8x8xf32>
    %28 = vector.shape_cast %27 : vector<8x8xf32> to vector<8x8x1xf32>
    %29 = tpu.reciprocal %28 {approx = true} : vector<8x8x1xf32> -> vector<8x8x1xf32>
    %30 = vector.broadcast %29 : vector<8x8x1xf32> to vector<8x8x8xf32>
    %31 = arith.mulf %26, %30 : vector<8x8x8xf32>
    %32 = arith.truncf %31 : vector<8x8x8xf32> to vector<8x8x8xbf16>
    %33 = arith.truncf %18 : vector<8x8x16xf32> to vector<8x8x16xbf16>
    "tpu.trace_start"() <{level = 10 : i32, message = "bqk,bkd->bqd"}> : () -> ()
    %cst_13 = arith.constant dense<0.000000e+00> : vector<8x8x16xf32>
    %34 = tpu.matmul %32, %33, %cst_13 {dimension_numbers = #tpu.dot_dimension_numbers<[2], [1], [1], [2], [0, 0, 0, 1, 1, 2], [0], [0]>} : vector<8x8x8xbf16>, vector<8x8x16xbf16>, vector<8x8x16xf32> -> vector<8x8x16xf32>
    "tpu.trace_stop"() : () -> ()
    %35 = vector.shape_cast %34 : vector<8x8x16xf32> to vector<64x16xf32>
    %36 = arith.truncf %35 : vector<64x16xf32> to vector<64x16xbf16>
    %c0_14 = arith.constant 0 : index
    %c0_15 = arith.constant 0 : index
    %37 = vector.load %arg5[%c0_14, %c0_15] : memref<32x32xbf16, #tpu.memory_space<vmem>>, vector<16x32xbf16>
    %cst_16 = arith.constant dense<0.000000e+00> : vector<64x32xf32>
    %38 = tpu.matmul %36, %37, %cst_16 {dimension_numbers = #tpu.dot_dimension_numbers<[1], [0], [0], [1], [0, 0, 1, 1], [], []>} : vector<64x16xbf16>, vector<16x32xbf16>, vector<64x32xf32> -> vector<64x32xf32>
    %39 = vector.broadcast %12 : vector<1x32xf32> to vector<64x32xf32>
    %40 = arith.addf %39, %38 : vector<64x32xf32>
    %41 = vector.extract_strided_slice %11 {offsets = [0, 16], sizes = [64, 16], strides = [1, 1]} : vector<64x96xf32> to vector<64x16xf32>
    %42 = vector.shape_cast %41 : vector<64x16xf32> to vector<8x8x16xf32>
    %43 = vector.extract_strided_slice %11 {offsets = [0, 48], sizes = [64, 16], strides = [1, 1]} : vector<64x96xf32> to vector<64x16xf32>
    %44 = vector.shape_cast %43 : vector<64x16xf32> to vector<8x8x16xf32>
    %45 = vector.extract_strided_slice %11 {offsets = [0, 80], sizes = [64, 16], strides = [1, 1]} : vector<64x96xf32> to vector<64x16xf32>
    %46 = vector.shape_cast %45 : vector<64x16xf32> to vector<8x8x16xf32>
    %47 = arith.truncf %42 : vector<8x8x16xf32> to vector<8x8x16xbf16>
    %48 = arith.truncf %44 : vector<8x8x16xf32> to vector<8x8x16xbf16>
    "tpu.trace_start"() <{level = 10 : i32, message = "bqd,bkd->bqk"}> : () -> ()
    %cst_17 = arith.constant dense<0.000000e+00> : vector<8x8x8xf32>
    %49 = tpu.matmul %47, %48, %cst_17 {dimension_numbers = #tpu.dot_dimension_numbers<[2], [2], [1], [1], [0, 0, 0, 1, 1, 1], [0], [0]>} : vector<8x8x16xbf16>, vector<8x8x16xbf16>, vector<8x8x8xf32> -> vector<8x8x8xf32>
    "tpu.trace_stop"() : () -> ()
    %cst_18 = arith.constant dense<0xFF800000> : vector<8x8xf32>
    %50 = vector.multi_reduction <maximumf>, %49, %cst_18 [2] : vector<8x8x8xf32> to vector<8x8xf32>
    %51 = vector.shape_cast %50 : vector<8x8xf32> to vector<8x8x1xf32>
    %52 = vector.broadcast %51 : vector<8x8x1xf32> to vector<8x8x8xf32>
    %53 = arith.subf %49, %52 : vector<8x8x8xf32>
    %54 = math.exp %53 : vector<8x8x8xf32>
    %cst_19 = arith.constant dense<0.000000e+00> : vector<8x8xf32>
    %55 = vector.multi_reduction <add>, %54, %cst_19 [2] : vector<8x8x8xf32> to vector<8x8xf32>
    %56 = vector.shape_cast %55 : vector<8x8xf32> to vector<8x8x1xf32>
    %57 = tpu.reciprocal %56 {approx = true} : vector<8x8x1xf32> -> vector<8x8x1xf32>
    %58 = vector.broadcast %57 : vector<8x8x1xf32> to vector<8x8x8xf32>
    %59 = arith.mulf %54, %58 : vector<8x8x8xf32>
    %60 = arith.truncf %59 : vector<8x8x8xf32> to vector<8x8x8xbf16>
    %61 = arith.truncf %46 : vector<8x8x16xf32> to vector<8x8x16xbf16>
    "tpu.trace_start"() <{level = 10 : i32, message = "bqk,bkd->bqd"}> : () -> ()
    %cst_20 = arith.constant dense<0.000000e+00> : vector<8x8x16xf32>
    %62 = tpu.matmul %60, %61, %cst_20 {dimension_numbers = #tpu.dot_dimension_numbers<[2], [1], [1], [2], [0, 0, 0, 1, 1, 2], [0], [0]>} : vector<8x8x8xbf16>, vector<8x8x16xbf16>, vector<8x8x16xf32> -> vector<8x8x16xf32>
    "tpu.trace_stop"() : () -> ()
    %63 = vector.shape_cast %62 : vector<8x8x16xf32> to vector<64x16xf32>
    %64 = arith.truncf %63 : vector<64x16xf32> to vector<64x16xbf16>
    %c16 = arith.constant 16 : index
    %c0_21 = arith.constant 0 : index
    %65 = vector.load %arg5[%c16, %c0_21] : memref<32x32xbf16, #tpu.memory_space<vmem>>, vector<16x32xbf16>
    %cst_22 = arith.constant dense<0.000000e+00> : vector<64x32xf32>
    %66 = tpu.matmul %64, %65, %cst_22 {dimension_numbers = #tpu.dot_dimension_numbers<[1], [0], [0], [1], [0, 0, 1, 1], [], []>} : vector<64x16xbf16>, vector<16x32xbf16>, vector<64x32xf32> -> vector<64x32xf32>
    %67 = arith.addf %40, %66 : vector<64x32xf32>
    %68 = arith.addf %5, %67 : vector<64x32xf32>
    %c0_23 = arith.constant 0 : index
    %c0_24 = arith.constant 0 : index
    %69 = vector.load %arg7[%c0_23, %c0_24] : memref<1x32xf32, #tpu.memory_space<vmem>>, vector<1x32xf32>
    %c0_25 = arith.constant 0 : index
    %c0_26 = arith.constant 0 : index
    %70 = vector.load %arg8[%c0_25, %c0_26] : memref<1x32xf32, #tpu.memory_space<vmem>>, vector<1x32xf32>
    %cst_27 = arith.constant dense<0.000000e+00> : vector<64xf32>
    %71 = vector.multi_reduction <add>, %68, %cst_27 [1] : vector<64x32xf32> to vector<64xf32>
    %72 = vector.shape_cast %71 : vector<64xf32> to vector<64x1xf32>
    %cst_28 = arith.constant 3.200000e+01 : f32
    %73 = vector.broadcast %cst_28 : f32 to vector<64x1xf32>
    %74 = arith.divf %72, %73 : vector<64x1xf32>
    %75 = vector.broadcast %74 : vector<64x1xf32> to vector<64x32xf32>
    %76 = arith.subf %68, %75 : vector<64x32xf32>
    %77 = arith.mulf %76, %76 : vector<64x32xf32>
    %cst_29 = arith.constant dense<0.000000e+00> : vector<64xf32>
    %78 = vector.multi_reduction <add>, %77, %cst_29 [1] : vector<64x32xf32> to vector<64xf32>
    %79 = vector.shape_cast %78 : vector<64xf32> to vector<64x1xf32>
    %cst_30 = arith.constant 3.200000e+01 : f32
    %80 = vector.broadcast %cst_30 : f32 to vector<64x1xf32>
    %81 = arith.divf %79, %80 : vector<64x1xf32>
    %82 = vector.broadcast %74 : vector<64x1xf32> to vector<64x32xf32>
    %83 = arith.subf %68, %82 : vector<64x32xf32>
    %cst_31 = arith.constant 9.99999974E-6 : f32
    %84 = vector.broadcast %cst_31 : f32 to vector<64x1xf32>
    %85 = arith.addf %81, %84 : vector<64x1xf32>
    %86 = math.rsqrt %85 : vector<64x1xf32>
    %87 = vector.broadcast %86 : vector<64x1xf32> to vector<64x32xf32>
    %88 = arith.mulf %83, %87 : vector<64x32xf32>
    %89 = vector.broadcast %69 : vector<1x32xf32> to vector<64x32xf32>
    %90 = arith.mulf %88, %89 : vector<64x32xf32>
    %91 = vector.broadcast %70 : vector<1x32xf32> to vector<64x32xf32>
    %92 = arith.addf %90, %91 : vector<64x32xf32>
    %93 = arith.truncf %92 : vector<64x32xf32> to vector<64x32xbf16>
    %c0_32 = arith.constant 0 : index
    %c0_33 = arith.constant 0 : index
    %94 = vector.load %arg9[%c0_32, %c0_33] : memref<32x64xbf16, #tpu.memory_space<vmem>>, vector<32x64xbf16>
    %cst_34 = arith.constant dense<0.000000e+00> : vector<64x64xf32>
    %95 = tpu.matmul %93, %94, %cst_34 {dimension_numbers = #tpu.dot_dimension_numbers<[1], [0], [0], [1], [0, 0, 1, 1], [], []>} : vector<64x32xbf16>, vector<32x64xbf16>, vector<64x64xf32> -> vector<64x64xf32>
    %c0_35 = arith.constant 0 : index
    %c0_36 = arith.constant 0 : index
    %96 = vector.load %arg10[%c0_35, %c0_36] : memref<1x64xf32, #tpu.memory_space<vmem>>, vector<1x64xf32>
    %97 = vector.broadcast %96 : vector<1x64xf32> to vector<64x64xf32>
    %98 = arith.addf %95, %97 : vector<64x64xf32>
    %cst_37 = arith.constant 0.000000e+00 : f32
    %99 = vector.broadcast %cst_37 : f32 to vector<64x64xf32>
    %100 = arith.maximumf %98, %99 : vector<64x64xf32>
    %101 = arith.truncf %100 : vector<64x64xf32> to vector<64x64xbf16>
    %c0_38 = arith.constant 0 : index
    %c0_39 = arith.constant 0 : index
    %102 = vector.load %arg11[%c0_38, %c0_39] : memref<64x32xbf16, #tpu.memory_space<vmem>>, vector<64x32xbf16>
    %cst_40 = arith.constant dense<0.000000e+00> : vector<64x32xf32>
    %103 = tpu.matmul %101, %102, %cst_40 {dimension_numbers = #tpu.dot_dimension_numbers<[1], [0], [0], [1], [0, 0, 1, 1], [], []>} : vector<64x64xbf16>, vector<64x32xbf16>, vector<64x32xf32> -> vector<64x32xf32>
    %c0_41 = arith.constant 0 : index
    %c0_42 = arith.constant 0 : index
    %104 = vector.load %arg12[%c0_41, %c0_42] : memref<1x32xf32, #tpu.memory_space<vmem>>, vector<1x32xf32>
    %105 = vector.broadcast %104 : vector<1x32xf32> to vector<64x32xf32>
    %106 = arith.addf %103, %105 : vector<64x32xf32>
    %107 = arith.addf %92, %106 : vector<64x32xf32>
    %c0_43 = arith.constant 0 : index
    %c0_44 = arith.constant 0 : index
    %108 = vector.load %arg13[%c0_43, %c0_44] : memref<1x32xf32, #tpu.memory_space<vmem>>, vector<1x32xf32>
    %c0_45 = arith.constant 0 : index
    %c0_46 = arith.constant 0 : index
    %109 = vector.load %arg14[%c0_45, %c0_46] : memref<1x32xf32, #tpu.memory_space<vmem>>, vector<1x32xf32>
    %cst_47 = arith.constant dense<0.000000e+00> : vector<64xf32>
    %110 = vector.multi_reduction <add>, %107, %cst_47 [1] : vector<64x32xf32> to vector<64xf32>
    %111 = vector.shape_cast %110 : vector<64xf32> to vector<64x1xf32>
    %cst_48 = arith.constant 3.200000e+01 : f32
    %112 = vector.broadcast %cst_48 : f32 to vector<64x1xf32>
    %113 = arith.divf %111, %112 : vector<64x1xf32>
    %114 = vector.broadcast %113 : vector<64x1xf32> to vector<64x32xf32>
    %115 = arith.subf %107, %114 : vector<64x32xf32>
    %116 = arith.mulf %115, %115 : vector<64x32xf32>
    %cst_49 = arith.constant dense<0.000000e+00> : vector<64xf32>
    %117 = vector.multi_reduction <add>, %116, %cst_49 [1] : vector<64x32xf32> to vector<64xf32>
    %118 = vector.shape_cast %117 : vector<64xf32> to vector<64x1xf32>
    %cst_50 = arith.constant 3.200000e+01 : f32
    %119 = vector.broadcast %cst_50 : f32 to vector<64x1xf32>
    %120 = arith.divf %118, %119 : vector<64x1xf32>
    %121 = vector.broadcast %113 : vector<64x1xf32> to vector<64x32xf32>
    %122 = arith.subf %107, %121 : vector<64x32xf32>
    %cst_51 = arith.constant 9.99999974E-6 : f32
    %123 = vector.broadcast %cst_51 : f32 to vector<64x1xf32>
    %124 = arith.addf %120, %123 : vector<64x1xf32>
    %125 = math.rsqrt %124 : vector<64x1xf32>
    %126 = vector.broadcast %125 : vector<64x1xf32> to vector<64x32xf32>
    %127 = arith.mulf %122, %126 : vector<64x32xf32>
    %128 = vector.broadcast %108 : vector<1x32xf32> to vector<64x32xf32>
    %129 = arith.mulf %127, %128 : vector<64x32xf32>
    %130 = vector.broadcast %109 : vector<1x32xf32> to vector<64x32xf32>
    %131 = arith.addf %129, %130 : vector<64x32xf32>
    %132 = vector.shape_cast %131 : vector<64x32xf32> to vector<8x8x32xf32>
    %cst_52 = arith.constant dense<0.000000e+00> : vector<8x32xf32>
    %133 = vector.multi_reduction <add>, %132, %cst_52 [1] : vector<8x8x32xf32> to vector<8x32xf32>
    %cst_53 = arith.constant 8.000000e+00 : f32
    %134 = vector.broadcast %cst_53 : f32 to vector<8x32xf32>
    %135 = arith.divf %133, %134 : vector<8x32xf32>
    %136 = arith.truncf %135 : vector<8x32xf32> to vector<8x32xbf16>
    %c0_54 = arith.constant 0 : index
    %c0_55 = arith.constant 0 : index
    %137 = vector.load %arg15[%c0_54, %c0_55] : memref<32x32xbf16, #tpu.memory_space<vmem>>, vector<32x32xbf16>
    %cst_56 = arith.constant dense<0.000000e+00> : vector<8x32xf32>
    %138 = tpu.matmul %136, %137, %cst_56 {dimension_numbers = #tpu.dot_dimension_numbers<[1], [0], [0], [1], [0, 0, 1, 1], [], []>} : vector<8x32xbf16>, vector<32x32xbf16>, vector<8x32xf32> -> vector<8x32xf32>
    %c0_57 = arith.constant 0 : index
    %c0_58 = arith.constant 0 : index
    %139 = vector.load %arg16[%c0_57, %c0_58] : memref<1x32xf32, #tpu.memory_space<vmem>>, vector<1x32xf32>
    %140 = vector.broadcast %139 : vector<1x32xf32> to vector<8x32xf32>
    %141 = arith.addf %138, %140 : vector<8x32xf32>
    %cst_59 = arith.constant 0.000000e+00 : f32
    %142 = vector.broadcast %cst_59 : f32 to vector<8x32xf32>
    %143 = arith.maximumf %141, %142 : vector<8x32xf32>
    %144 = arith.truncf %143 : vector<8x32xf32> to vector<8x32xbf16>
    %c0_60 = arith.constant 0 : index
    %c0_61 = arith.constant 0 : index
    %145 = vector.load %arg17[%c0_60, %c0_61] : memref<32x2xbf16, #tpu.memory_space<vmem>>, vector<32x2xbf16>
    %cst_62 = arith.constant dense<0.000000e+00> : vector<8x2xf32>
    %146 = tpu.matmul %144, %145, %cst_62 {dimension_numbers = #tpu.dot_dimension_numbers<[1], [0], [0], [1], [0, 0, 1, 1], [], []>} : vector<8x32xbf16>, vector<32x2xbf16>, vector<8x2xf32> -> vector<8x2xf32>
    %c0_63 = arith.constant 0 : index
    %c0_64 = arith.constant 0 : index
    %147 = vector.load %arg18[%c0_63, %c0_64] : memref<1x2xf32, #tpu.memory_space<vmem>>, vector<1x2xf32>
    %148 = vector.broadcast %147 : vector<1x2xf32> to vector<8x2xf32>
    %149 = arith.addf %146, %148 : vector<8x2xf32>
    %cst_65 = arith.constant dense<0xFF800000> : vector<8xf32>
    %150 = vector.multi_reduction <maximumf>, %149, %cst_65 [1] : vector<8x2xf32> to vector<8xf32>
    %151 = vector.shape_cast %150 : vector<8xf32> to vector<8x1xf32>
    %152 = vector.broadcast %151 : vector<8x1xf32> to vector<8x2xf32>
    %153 = arith.subf %149, %152 : vector<8x2xf32>
    %154 = math.exp %153 : vector<8x2xf32>
    %cst_66 = arith.constant dense<0.000000e+00> : vector<8xf32>
    %155 = vector.multi_reduction <add>, %154, %cst_66 [1] : vector<8x2xf32> to vector<8xf32>
    %156 = vector.shape_cast %155 : vector<8xf32> to vector<8x1xf32>
    %157 = vector.broadcast %156 : vector<8x1xf32> to vector<8x2xf32>
    %158 = arith.divf %154, %157 : vector<8x2xf32>
    %c0_67 = arith.constant 0 : index
    %c0_68 = arith.constant 0 : index
    %159 = vector.load %arg19[%c0_67, %c0_68] : memref<8x2xf32, #tpu.memory_space<vmem>>, vector<8x2xf32>
    tpu.vector_store %arg19[%c0_67, %c0_68], %158 {strides = array<i32>} : memref<8x2xf32, #tpu.memory_space<vmem>>, vector<8x2xf32>,
    return
  }
  func.func @transform_0(%arg0: i32) -> (i32, i32, i32) {
    %c0_i32 = arith.constant 0 : i32
    %c0_i32_0 = arith.constant 0 : i32
    %c0_i32_1 = arith.constant 0 : i32
    return %arg0, %c0_i32, %c0_i32_0 : i32, i32, i32
  }
  func.func @transform_1(%arg0: i32) -> (i32, i32) {
    %c0_i32 = arith.constant 0 : i32
    %c0_i32_0 = arith.constant 0 : i32
    %c0_i32_1 = arith.constant 0 : i32
    return %c0_i32, %c0_i32_0 : i32, i32
  }
  func.func @transform_2(%arg0: i32) -> (i32, i32) {
    %c0_i32 = arith.constant 0 : i32
    %c0_i32_0 = arith.constant 0 : i32
    %c0_i32_1 = arith.constant 0 : i32
    return %c0_i32, %c0_i32_0 : i32, i32
  }
  func.func @transform_3(%arg0: i32) -> (i32, i32) {
    %c0_i32 = arith.constant 0 : i32
    %c0_i32_0 = arith.constant 0 : i32
    %c0_i32_1 = arith.constant 0 : i32
    return %c0_i32, %c0_i32_0 : i32, i32
  }
  func.func @transform_4(%arg0: i32) -> (i32, i32) {
    %c0_i32 = arith.constant 0 : i32
    %c0_i32_0 = arith.constant 0 : i32
    %c0_i32_1 = arith.constant 0 : i32
    return %c0_i32, %c0_i32_0 : i32, i32
  }
  func.func @transform_5(%arg0: i32) -> (i32, i32) {
    %c0_i32 = arith.constant 0 : i32
    %c0_i32_0 = arith.constant 0 : i32
    %c0_i32_1 = arith.constant 0 : i32
    return %c0_i32, %c0_i32_0 : i32, i32
  }
  func.func @transform_6(%arg0: i32) -> (i32, i32) {
    %c0_i32 = arith.constant 0 : i32
    %c0_i32_0 = arith.constant 0 : i32
    %c0_i32_1 = arith.constant 0 : i32
    return %c0_i32, %c0_i32_0 : i32, i32
  }
  func.func @transform_7(%arg0: i32) -> (i32, i32) {
    %c0_i32 = arith.constant 0 : i32
    %c0_i32_0 = arith.constant 0 : i32
    %c0_i32_1 = arith.constant 0 : i32
    return %c0_i32, %c0_i32_0 : i32, i32
  }
  func.func @transform_8(%arg0: i32) -> (i32, i32) {
    %c0_i32 = arith.constant 0 : i32
    %c0_i32_0 = arith.constant 0 : i32
    %c0_i32_1 = arith.constant 0 : i32
    return %c0_i32, %c0_i32_0 : i32, i32
  }
  func.func @transform_9(%arg0: i32) -> (i32, i32) {
    %c0_i32 = arith.constant 0 : i32
    %c0_i32_0 = arith.constant 0 : i32
    %c0_i32_1 = arith.constant 0 : i32
    return %c0_i32, %c0_i32_0 : i32, i32
  }
  func.func @transform_10(%arg0: i32) -> (i32, i32) {
    %c0_i32 = arith.constant 0 : i32
    %c0_i32_0 = arith.constant 0 : i32
    %c0_i32_1 = arith.constant 0 : i32
    return %c0_i32, %c0_i32_0 : i32, i32
  }
  func.func @transform_11(%arg0: i32) -> (i32, i32) {
    %c0_i32 = arith.constant 0 : i32
    %c0_i32_0 = arith.constant 0 : i32
    %c0_i32_1 = arith.constant 0 : i32
    return %c0_i32, %c0_i32_0 : i32, i32
  }
  func.func @transform_12(%arg0: i32) -> (i32, i32) {
    %c0_i32 = arith.constant 0 : i32
    %c0_i32_0 = arith.constant 0 : i32
    %c0_i32_1 = arith.constant 0 : i32
    return %c0_i32, %c0_i32_0 : i32, i32
  }
  func.func @transform_13(%arg0: i32) -> (i32, i32) {
    %c0_i32 = arith.constant 0 : i32
    %c0_i32_0 = arith.constant 0 : i32
    %c0_i32_1 = arith.constant 0 : i32
    return %c0_i32, %c0_i32_0 : i32, i32
  }
  func.func @transform_14(%arg0: i32) -> (i32, i32) {
    %c0_i32 = arith.constant 0 : i32
    %c0_i32_0 = arith.constant 0 : i32
    %c0_i32_1 = arith.constant 0 : i32
    return %c0_i32, %c0_i32_0 : i32, i32
  }
  func.func @transform_15(%arg0: i32) -> (i32, i32) {
    %c0_i32 = arith.constant 0 : i32
    %c0_i32_0 = arith.constant 0 : i32
    %c0_i32_1 = arith.constant 0 : i32
    return %c0_i32, %c0_i32_0 : i32, i32
  }
  func.func @transform_16(%arg0: i32) -> (i32, i32) {
    %c0_i32 = arith.constant 0 : i32
    %c0_i32_0 = arith.constant 0 : i32
    %c0_i32_1 = arith.constant 0 : i32
    return %c0_i32, %c0_i32_0 : i32, i32
  }
  func.func @transform_17(%arg0: i32) -> (i32, i32) {
    %c0_i32 = arith.constant 0 : i32
    %c0_i32_0 = arith.constant 0 : i32
    %c0_i32_1 = arith.constant 0 : i32
    return %c0_i32, %c0_i32_0 : i32, i32
  }
  func.func @transform_18(%arg0: i32) -> (i32, i32) {
    %c0_i32 = arith.constant 0 : i32
    %c0_i32_0 = arith.constant 0 : i32
    return %arg0, %c0_i32 : i32, i32
  }
}

</mosaic_0001>

<bundles_post_ra>
// kernel: tpu_custom_call.1
= control target key start
LH: loop header
LB: loop body
LE: loop exit
PB: predicated region body
PF: predicated region fallthrough
CT: control target
= control target key end

     0   :  { %s3243_s0 = inlined_call_operand.vmem [shape: f32[8,8,32], index: 0, kind: input, shape index: {}]   ;;  %s3244_s1 = inlined_call_operand.hbm [shape: f32[8,32], index: 1, kind: input, shape index: {}]   ;;  %s3245_s2 = inlined_call_operand.hbm [shape: bf16[32,96], index: 2, kind: input, shape index: {}]   ;;  %s3246_s3 = inlined_call_operand.vmem [shape: f32[1,96], index: 3, kind: input, shape index: {}]   ;;  %s3247_s4 = inlined_call_operand.hbm [shape: bf16[32,32], index: 4, kind: input, shape index: {}]   ;;  %s3248_s5 = inlined_call_operand.vmem [shape: f32[1,32], index: 5, kind: input, shape index: {}]   ;;  %s3249_s6 = inlined_call_operand.vmem [shape: f32[1,32], index: 6, kind: input, shape index: {}]   ;;  %s3250_s7 = inlined_call_operand.vmem [shape: f32[1,32], index: 7, kind: input, shape index: {}]   ;;  %s3251_s8 = inlined_call_operand.hbm [shape: bf16[32,64], index: 8, kind: input, shape index: {}]   ;;  %s3252_s9 = inlined_call_operand.vmem [shape: f32[1,64], index: 9, kind: input, shape index: {}]   ;;  %s3253_s10 = inlined_call_operand.vmem [shape: bf16[64,32], index: 10, kind: input, shape index: {}]   ;;  %s3254_s11 = inlined_call_operand.vmem [shape: f32[1,32], index: 11, kind: input, shape index: {}]   ;;  %s3255_s12 = inlined_call_operand.vmem [shape: f32[1,32], index: 12, kind: input, shape index: {}]   ;;  %s3256_s13 = inlined_call_operand.vmem [shape: f32[1,32], index: 13, kind: input, shape index: {}]   ;;  %s3257_s14 = inlined_call_operand.hbm [shape: bf16[32,32], index: 14, kind: input, shape index: {}]   ;;  %s3258_s15 = inlined_call_operand.vmem [shape: f32[1,32], index: 15, kind: input, shape index: {}]   ;;  %s3259_s16 = inlined_call_operand.vmem [shape: bf16[32,2], index: 16, kind: input, shape index: {}]   ;;  %s3260_s17 = inlined_call_operand.vmem [shape: f32[1,2], index: 17, kind: input, shape index: {}]   ;;  %s3261_s18 = inlined_call_operand.vmem [shape: f32[8,2], index: 18, kind: output, shape index: {}]  }
   0x1   :  { %3263 = sst [smem:[#allocation13_spill]] %s3243_s0 }
   0x2   :  { %3264 = sst [smem:[#allocation14_spill]] %s3244_s1 }
   0x3   :  { %3265 = sst [smem:[#allocation15_spill]] %s3245_s2 }
   0x4   :  { %3266 = sst [smem:[#allocation16_spill]] %s3261_s18 }
   0x5   :  { %23 = vsyncpa [#allocation3], 0 }
   0x6   :  { %24 = vsyncpa [#allocation5], 0  ;;  %s3267_s29 = sld [smem:[#allocation15_spill]] }
   0xc   :  { %s43_s30 = sshll.u32 %s3267_s29, 4  ;;  %s44_s30 = int_to_ptr.hbm [resolvable:$true] %s43_s30 }
   0xd   :  { %25 = vsyncpa [#allocation8], 0  ;;  %s2432_s0 = smov [#allocation4]   ;;  %s77_s21 = sshll.u32 %s3251_s8, 4  ;;  %s78_s21 = int_to_ptr.hbm [resolvable:$true] %s77_s21 }
   0xe   :  { %s45_s19 = sshll.u32 %s2432_s0, 4  ;;  %s2433_s22 = smov 64   ;;  %s46_s19 = int_to_ptr.vmem [resolvable:$true] %s45_s19 }
   0xf   :  { %s2434_s2 = smov 4   ;;  %s2435_s23 = smov [#allocation7]  }
  0x10   :  { %51 = dma.hbm_to_vmem [thread:$0]  %s44_s30, 256, %s46_s19, [#allocation5], %s2433_s22, %s2433_s22, %s2434_s2  }
  0x11   :  { %s79_s24 = sshll.u32 %s2435_s23, 4  ;;  %s3268_s27 = sld [smem:[#allocation14_spill]]  ;;  %s80_s24 = int_to_ptr.vmem [resolvable:$true] %s79_s24 }
  0x12   :  { %85 = dma.hbm_to_vmem [thread:$0]  %s78_s21, 256, %s80_s24, [#allocation8], %s2433_s22, %s2433_s22, %s2434_s2  }
  0x13   :  { %s58_s8 = sshll.u32 %s3247_s4, 4  ;;  %s2436_s1 = smov [#allocation2]   ;;  %s59_s8 = int_to_ptr.hbm [resolvable:$true] %s58_s8 }
  0x14   :  { %s35_s20 = sshll.u32 %s2436_s1, 4  ;;  %s2437_s30 = smov [#allocation6]   ;;  %s36_s20 = int_to_ptr.vmem [resolvable:$true] %s35_s20 }
  0x15   :  { %s60_s19 = sshll.u32 %s2437_s30, 4  ;;  %s100_s25 = sshll.u32 %s3257_s14, 4  ;;  %s61_s19 = int_to_ptr.vmem [resolvable:$true] %s60_s19  ;;  %s101_s25 = int_to_ptr.hbm [resolvable:$true] %s100_s25 }
  0x16   :  { %66 = dma.hbm_to_vmem [thread:$0]  %s59_s8, 256, %s61_s19, [#allocation5], %s2433_s22, %s2433_s22, %s2434_s2  }
  0x17   :  { %s33_s28 = sshll.u32 %s3268_s27, 4  ;;  %s2438_s21 = smov [#allocation9]   ;;  %s34_s28 = int_to_ptr.hbm [resolvable:$true] %s33_s28 }
  0x18   :  { %38 = dma.hbm_to_vmem [thread:$0]  %s34_s28, 128, %s36_s20, [#allocation3]  }
  0x19   :  { %s102_s24 = sshll.u32 %s2438_s21, 4  ;;  %s103_s24 = int_to_ptr.vmem [resolvable:$true] %s102_s24 }
  0x1a   :  { %108 = dma.hbm_to_vmem [thread:$0]  %s101_s25, 256, %s103_s24, [#allocation8], %s2433_s22, %s2433_s22, %s2434_s2  }
  0x1b   :  { %2426 = dma.done.wait [#allocation3], 128  }
  0x1c   :  { %2427 = vsyncadd [#allocation3], 4294967168 }
  0x1d   :  { %2428 = dma.done.wait [#allocation5], 512  }
  0x1e   :  { %2429 = vsyncadd [#allocation5], 4294966784 }
  0x1f   :  { %2430 = dma.done.wait [#allocation8], 512  }
  0x20   :  { %2431 = vsyncadd [#allocation8], 4294966784  ;;  %v2166_v0 = vld [vmem:[#allocation4 + $0x8] sm:$0xff]  ;;  %s3269_s18 = sld [smem:[#allocation13_spill]]  ;;  %v144_v3 = vld [vmem:[#allocation2] sm:$0xff]  ;;  %vm177_vm0 = vcmask 261120  }
  0x21   :  { %196 = vmatpush.bf16.msra.mxu0 %v2166_v0  ;;  %v2165_v4 = vld [vmem:[#allocation4] sm:$0xff]  ;;  %v2192_v23 = vld [vmem:[%s3246_s3] ss:$0 sm:$0xff]  ;;  %s2439_s14 = smov 96   ;;  %vm233_vm1 = vcmask 130048   ;;  %vm523_vm2 = vcmask 1043456  }
  0x22   :  { %vm421_vm3 = vcmask 64512   ;;  %s2440_s3 = smov 80  }
  0x25   :  { %197 = vmatpush.bf16.msra.mxu0 %v2165_v4 }
  0x26   :  { %v136_v1 = vld [vmem:[%s3269_s18] sm:$0xff]  ;;  %v137_v2 = vld [vmem:[%s3269_s18 + $0x8] sm:$0xff]  ;;  %v138_v8 = vld [vmem:[%s3269_s18 + $0x10] sm:$0xff] }
  0x27   :  { %v2569_v5 = vadd.f32 %v144_v3, %v136_v1  ;;  %v2571_v6 = vadd.f32 %v144_v3, %v137_v2  ;;  %v139_v9 = vld [vmem:[%s3269_s18 + $0x18] sm:$0xff]  ;;  %v2582_v10 = vadd.f32 %v144_v3, %v138_v8  ;;  %v140_v13 = vld [vmem:[%s3269_s18 + $0x20] sm:$0xff]  ;;  %v141_v14 = vld [vmem:[%s3269_s18 + $0x28] sm:$0xff] }
  0x28   :  { %v2584_v11 = vadd.f32 %v144_v3, %v139_v9  ;;  %v2595_v15 = vadd.f32 %v144_v3, %v140_v13  ;;  %v2597_v16 = vadd.f32 %v144_v3, %v141_v14  ;;  %v142_v18 = vld [vmem:[%s3269_s18 + $0x30] sm:$0xff]  ;;  %v143_v19 = vld [vmem:[%s3269_s18 + $0x38] sm:$0xff]  ;;  %s2441_s18 = smov 112  }
  0x29   :  { %v153_v7 = vpack.c.bf16 %v2571_v6, %v2569_v5  ;;  %v2608_v20 = vadd.f32 %v144_v3, %v142_v18  ;;  %v2610_v21 = vadd.f32 %v144_v3, %v143_v19 }
  0x2a   :  { %v154_v12 = vpack.c.bf16 %v2584_v11, %v2582_v10  ;;  %v155_v17 = vpack.c.bf16 %v2597_v16, %v2595_v15 }
  0x2b   :  { %2063 = vmatmul.msk.bf16.vlgmr.msra.gmra.mxu0 %vm177_vm0, %v153_v7  ;;  %v156_v22 = vpack.c.bf16 %v2610_v21, %v2608_v20 }
  0x3b   :  { %2064 = vmatmul.msk.bf16.gmra.mxu0 %vm177_vm0, %v154_v12 }
  0x4b   :  { %2065 = vmatmul.msk.bf16.gmra.mxu0 %vm177_vm0, %v155_v17 }
  0x5b   :  { %2066 = vmatmul.msk.bf16.gmra.mxu0 %vm177_vm0, %v156_v22 }
  0xa8   :  { %v199_v24 = vpop.f32.mrf.mxu0 }
  0xa9   :  { %v200_v25 = vadd.f32 %v2192_v23, %v199_v24 }
  0xab   :  { %v220_v26 = vpack.c.bf16 %v200_v25, %v200_v25 }
  0xad   :  { %v229_v27 = vunpack.c.l.b16 %v220_v26 }
  0xaf   :  { %v2618_v28 = vpack.c.b16 %v229_v27, %v229_v27 }
  0xb0   :  { %v201_v29 = vpop.f32.mrf.mxu0 }
  0xb1   :  { %v202_v30 = vadd.f32 %v2192_v23, %v201_v29  ;;  %231 = vrot.lane.b32.xlu0 %v2618_v28, %s2439_s14 }
  0xb3   :  { %v221_v31 = vpack.c.bf16 %v202_v30, %v202_v30 }
  0xb5   :  { %v254_v32 = vunpack.c.l.b16 %v221_v31 }
  0xb7   :  { %v2622_v33 = vpack.c.b16 %v254_v32, %v254_v32 }
  0xb8   :  { %v204_v34 = vpop.f32.mrf.mxu0 }
  0xb9   :  { %v205_v35 = vadd.f32 %v2192_v23, %v204_v34  ;;  %256 = vrot.lane.b32.xlu0 %v2622_v33, %s2439_s14 }
  0xbb   :  { %v222_v36 = vpack.c.bf16 %v205_v35, %v205_v35 }
  0xbd   :  { %v278_v37 = vunpack.c.l.b16 %v222_v36 }
  0xbf   :  { %v2626_v38 = vpack.c.b16 %v278_v37, %v278_v37 }
  0xc0   :  { %v206_v39 = vpop.f32.mrf.mxu0 }
  0xc1   :  { %v207_v40 = vadd.f32 %v2192_v23, %v206_v39  ;;  %280 = vrot.lane.b32.xlu1 %v2626_v38, %s2439_s14 }
  0xc3   :  { %v223_v41 = vpack.c.bf16 %v207_v40, %v207_v40 }
  0xc5   :  { %v302_v42 = vunpack.c.l.b16 %v223_v41 }
  0xc7   :  { %v2630_v43 = vpack.c.b16 %v302_v42, %v302_v42 }
  0xc8   :  { %v209_v44 = vpop.f32.mrf.mxu0 }
  0xc9   :  { %v210_v45 = vadd.f32 %v2192_v23, %v209_v44  ;;  %304 = vrot.lane.b32.xlu1 %v2630_v43, %s2439_s14 }
  0xcb   :  { %v224_v46 = vpack.c.bf16 %v210_v45, %v210_v45 }
  0xcd   :  { %v326_v47 = vunpack.c.l.b16 %v224_v46 }
  0xcf   :  { %v2634_v48 = vpack.c.b16 %v326_v47, %v326_v47 }
  0xd0   :  { %v211_v49 = vpop.f32.mrf.mxu0 }
  0xd1   :  { %v212_v50 = vadd.f32 %v2192_v23, %v211_v49  ;;  %328 = vrot.lane.b32.xlu2 %v2634_v48, %s2439_s14 }
  0xd3   :  { %v225_v51 = vpack.c.bf16 %v212_v50, %v212_v50 }
  0xd5   :  { %v350_v52 = vunpack.c.l.b16 %v225_v51 }
  0xd7   :  { %v2638_v53 = vpack.c.b16 %v350_v52, %v350_v52 }
  0xd8   :  { %v214_v54 = vpop.f32.mrf.mxu0 }
  0xd9   :  { %v215_v55 = vadd.f32 %v2192_v23, %v214_v54  ;;  %352 = vrot.lane.b32.xlu2 %v2638_v53, %s2439_s14 }
  0xdb   :  { %v226_v56 = vpack.c.bf16 %v215_v55, %v215_v55 }
  0xdd   :  { %v374_v57 = vunpack.c.l.b16 %v226_v56 }
  0xdf   :  { %v2642_v58 = vpack.c.b16 %v374_v57, %v374_v57 }
  0xe0   :  { %v216_v59 = vpop.f32.mrf.mxu0 }
  0xe1   :  { %v217_v60 = vadd.f32 %v2192_v23, %v216_v59  ;;  %540 = vrot.lane.b32.xlu2 %v2622_v33, %s2433_s22  ;;  %376 = vrot.lane.b32.xlu0 %v2642_v58, %s2439_s14 }
  0xe3   :  { %v227_v61 = vpack.c.bf16 %v217_v60, %v217_v60 }
  0xe5   :  { %v398_v62 = vunpack.c.l.b16 %v227_v61 }
  0xe7   :  { %v2648_v63 = vpack.c.b16 %v398_v62, %v398_v62 }
  0xe9   :  { %400 = vrot.lane.b32.xlu1 %v2648_v63, %s2439_s14  ;;  %582 = vrot.lane.b32.xlu0 %v2630_v43, %s2433_s22 }
  0xf1   :  { %518 = vrot.lane.b32.xlu1 %v2618_v28, %s2433_s22 }
  0xf9   :  { %561 = vrot.lane.b32.xlu1 %v2626_v38, %s2433_s22 }
 0x101   :  { %603 = vrot.lane.b32.xlu1 %v2634_v48, %s2433_s22 }
 0x123   :  { %v232_v0 = vpop.permute.xlu0 %231 }
 0x124   :  { %v238_v1 = vsel %vm233_vm1, %v232_v0, 0 }
 0x125   :  { %247 = vmatpush.bf16.xpose.msra.mxu1 %v238_v1 }
 0x12b   :  { %v329_v2 = vpop.permute.xlu2 %328  ;;  %v257_v3 = vpop.permute.xlu0 %256 }
 0x12c   :  { %2067 = vmatmul.msk.bf16.vlgmr.msra.gmra.mxu1 %vm233_vm1, %v220_v26  ;;  %v262_v4 = vsel %vm233_vm1, %v257_v3, 0  ;;  %v334_v7 = vsel %vm233_vm1, %v329_v2, 0 }
 0x12d   :  { %271 = vmatpush.bf16.xpose.msra.mxu2 %v262_v4 }
 0x133   :  { %v353_v8 = vpop.permute.xlu2 %352  ;;  %v281_v9 = vpop.permute.xlu1 %280 }
 0x134   :  { %2068 = vmatmul.msk.bf16.vlgmr.msra.gmra.mxu2 %vm233_vm1, %v221_v31  ;;  %v286_v12 = vsel %vm233_vm1, %v281_v9, 0  ;;  %v358_v13 = vsel %vm233_vm1, %v353_v8, 0 }
 0x135   :  { %343 = vmatpush.bf16.xpose.msrb.mxu2 %v334_v7  ;;  %295 = vmatpush.bf16.xpose.msra.mxu3 %v286_v12 }
 0x13b   :  { %v305_v14 = vpop.permute.xlu1 %304  ;;  %v541_v18 = vpop.permute.xlu2 %540 }
 0x13c   :  { %2069 = vmatmul.msk.bf16.vlgmr.msra.gmra.mxu3 %vm233_vm1, %v222_v36  ;;  %v310_v17 = vsel %vm233_vm1, %v305_v14, 0  ;;  %v546_v23 = vsel %vm523_vm2, %v541_v18, 0 }
 0x13d   :  { %367 = vmatpush.bf16.xpose.msrb.mxu3 %v358_v13  ;;  %319 = vmatpush.bf16.xpose.msrb.mxu1 %v310_v17 }
 0x144   :  { %2070 = vmatmul.msk.bf16.vlgmr.msrb.gmra.mxu1 %vm233_vm1, %v223_v41  ;;  %2071 = vmatmul.msk.bf16.vlgmr.msrb.gmra.mxu2 %vm233_vm1, %v224_v46 }
 0x14c   :  { %2072 = vmatmul.msk.bf16.vlgmr.msrb.gmra.mxu3 %vm233_vm1, %v225_v51 }
 0x153   :  { %v377_v19 = vpop.permute.xlu0 %376 }
 0x154   :  { %v382_v22 = vsel %vm233_vm1, %v377_v19, 0 }
 0x155   :  { %391 = vmatpush.bf16.xpose.msra.mxu1 %v382_v22 }
 0x15b   :  { %v401_v24 = vpop.permute.xlu1 %400  ;;  %v583_v26 = vpop.permute.xlu0 %582 }
 0x15c   :  { %v406_v25 = vsel %vm233_vm1, %v401_v24, 0  ;;  %2073 = vmatmul.msk.bf16.vlgmr.msra.gmra.mxu1 %vm233_vm1, %v226_v56  ;;  %v588_v30 = vsel %vm523_vm2, %v583_v26, 0 }
 0x15d   :  { %555 = vmatpush.bf16.msrb.mxu1 %v546_v23  ;;  %415 = vmatpush.bf16.xpose.msra.mxu2 %v406_v25 }
 0x163   :  { %v519_v27 = vpop.permute.xlu1 %518 }
 0x164   :  { %v525_v29 = vsel %vm523_vm2, %v519_v27, 0  ;;  %2074 = vmatmul.msk.bf16.vlgmr.msra.gmra.mxu2 %vm233_vm1, %v227_v61 }
 0x165   :  { %534 = vmatpush.bf16.msra.mxu3 %v525_v29 }
 0x169   :  { %597 = vmatpush.bf16.msrb.mxu3 %v588_v30 }
 0x16b   :  { %v562_v31 = vpop.permute.xlu1 %561 }
 0x16c   :  { %v567_v32 = vsel %vm523_vm2, %v562_v31, 0 }
 0x16d   :  { %576 = vmatpush.bf16.msrb.mxu2 %v567_v32 }
 0x173   :  { %v2704_v3 = vpop.permute.xlu1 %603 }
 0x1a9   :  { %v249_v34 = vpop.f32.mrf.mxu1 }
 0x1aa   :  { %v422_v35 = vsel %vm421_vm3, %v249_v34, -inf }
 0x1ab   :  { %423 = vmax.xlane.f32.xlu2 %v422_v35 }
 0x1b1   :  { %v251_v36 = vpop.f32.mrf.mxu1 }
 0x1b7   :  { %v273_v37 = vpop.f32.mrf.mxu2 }
 0x1b8   :  { %v425_v39 = vsel %vm421_vm3, %v273_v37, -inf }
 0x1b9   :  { %426 = vmax.xlane.f32.xlu1 %v425_v39 }
 0x1bf   :  { %v275_v40 = vpop.f32.mrf.mxu2  ;;  %v297_v41 = vpop.f32.mrf.mxu3 }
 0x1c0   :  { %v428_v42 = vsel %vm421_vm3, %v297_v41, -inf }
 0x1c1   :  { %429 = vmax.xlane.f32.xlu2 %v428_v42  ;;  %v321_v44 = vpop.f32.mrf.mxu1 }
 0x1c2   :  { %v431_v45 = vsel %vm421_vm3, %v321_v44, -inf }
 0x1c3   :  { %432 = vmax.xlane.f32.xlu0 %v431_v45 }
 0x1c7   :  { %v299_v46 = vpop.f32.mrf.mxu3  ;;  %v345_v47 = vpop.f32.mrf.mxu2 }
 0x1c8   :  { %v434_v49 = vsel %vm421_vm3, %v345_v47, -inf }
 0x1c9   :  { %v323_v50 = vpop.f32.mrf.mxu1  ;;  %435 = vmax.xlane.f32.xlu2 %v434_v49 }
 0x1cf   :  { %v347_v51 = vpop.f32.mrf.mxu2  ;;  %v2685_v52 = vpop.f32.mrf.mxu3 }
 0x1d0   :  { %v437_v54 = vsel %vm421_vm3, %v2685_v52, -inf }
 0x1d1   :  { %438 = vmax.xlane.f32.xlu0 %v437_v54 }
 0x1d7   :  { %v371_v55 = vpop.f32.mrf.mxu3 }
 0x1d9   :  { %v2689_v56 = vpop.f32.mrf.mxu1 }
 0x1da   :  { %v440_v57 = vsel %vm421_vm3, %v2689_v56, -inf }
 0x1db   :  { %441 = vmax.xlane.f32.xlu1 %v440_v57 }
 0x1e1   :  { %v395_v59 = vpop.f32.mrf.mxu1 }
 0x1e7   :  { %v417_v60 = vpop.f32.mrf.mxu2 }
 0x1e8   :  { %v443_v61 = vsel %vm421_vm3, %v417_v60, -inf }
 0x1e9   :  { %444 = vmax.xlane.f32.xlu2 %v443_v61 }
 0x1ef   :  { %v419_v62 = vpop.f32.mrf.mxu2 }
 0x1f0   :  { %v609_v62 = vsel %vm523_vm2, %v2704_v3, 0 }
 0x1f4   :  { %666 = vrot.lane.b32.xlu1 %v2648_v63, %s2433_s22 }
 0x1fc   :  { %753 = vrot.lane.b32.xlu1 %v2618_v28, %s2440_s3 }
 0x201   :  { %645 = vrot.lane.b32.xlu2 %v2642_v58, %s2433_s22 }
 0x204   :  { %751 = vrot.lane.b32.xlu1 %v2618_v28, %s2441_s18 }
 0x209   :  { %776 = vrot.lane.b32.xlu2 %v2622_v33, %s2440_s3 }
 0x21e   :  { %v424_v0 = vpop.xlane.xlu2 %423 }
 0x21f   :  { %v446_v1 = vsub.f32 %v249_v34, %v424_v0 }
 0x221   :  { %v454_v2 = vmul.f32 1.442695, %v446_v1 }
 0x223   :  { %2202 = vpow2.f32 %v454_v2 }
 0x229   :  { %v2706_v4 = vpop.eup %2202 }
 0x22a   :  { %v470_v7 = vsel %vm421_vm3, %v2706_v4, 0.0 }
 0x22b   :  { %471 = vadd.xlane.f32.xlu0 %v470_v7 }
 0x22c   :  { %v427_v8 = vpop.xlane.xlu1 %426 }
 0x22d   :  { %v447_v9 = vsub.f32 %v273_v37, %v427_v8 }
 0x22f   :  { %v456_v12 = vmul.f32 1.442695, %v447_v9 }
 0x231   :  { %2204 = vpow2.f32 %v456_v12 }
 0x234   :  { %v430_v13 = vpop.xlane.xlu2 %429 }
 0x235   :  { %v448_v14 = vsub.f32 %v297_v41, %v430_v13 }
 0x236   :  { %v433_v17 = vpop.xlane.xlu0 %432 }
 0x237   :  { %v2710_v18 = vpop.eup %2204  ;;  %v458_v19 = vmul.f32 1.442695, %v448_v14  ;;  %v449_v22 = vsub.f32 %v321_v44, %v433_v17 }
 0x238   :  { %v473_v23 = vsel %vm421_vm3, %v2710_v18, 0.0 }
 0x239   :  { %2206 = vpow2.f32 %v458_v19  ;;  %474 = vadd.xlane.f32.xlu0 %v473_v23  ;;  %v460_v24 = vmul.f32 1.442695, %v449_v22 }
 0x23b   :  { %2208 = vpow2.f32 %v460_v24 }
 0x23c   :  { %v436_v25 = vpop.xlane.xlu2 %435 }
 0x23d   :  { %v450_v26 = vsub.f32 %v345_v47, %v436_v25 }
 0x23f   :  { %v2714_v27 = vpop.eup %2206  ;;  %v462_v29 = vmul.f32 1.442695, %v450_v26 }
 0x240   :  { %v476_v30 = vsel %vm421_vm3, %v2714_v27, 0.0 }
 0x241   :  { %2210 = vpow2.f32 %v462_v29  ;;  %477 = vadd.xlane.f32.xlu2 %v476_v30  ;;  %v2718_v31 = vpop.eup %2208 }
 0x242   :  { %v479_v35 = vsel %vm421_vm3, %v2718_v31, 0.0 }
 0x244   :  { %v439_v37 = vpop.xlane.xlu0 %438 }
 0x245   :  { %v451_v40 = vsub.f32 %v2685_v52, %v439_v37 }
 0x247   :  { %v2720_v32 = vpop.eup %2210  ;;  %v464_v42 = vmul.f32 1.442695, %v451_v40 }
 0x248   :  { %v482_v34 = vsel %vm421_vm3, %v2720_v32, 0.0 }
 0x249   :  { %483 = vadd.xlane.f32.xlu1 %v482_v34  ;;  %480 = vadd.xlane.f32.xlu2 %v479_v35  ;;  %2212 = vpow2.f32 %v464_v42 }
 0x24d   :  { %624 = vrot.lane.b32.xlu0 %v2638_v53, %s2433_s22  ;;  %s2442_s22 = smov 48  }
 0x24e   :  { %v442_v47 = vpop.xlane.xlu1 %441 }
 0x24f   :  { %v2738_v46 = vpop.eup %2212  ;;  %v452_v50 = vsub.f32 %v2689_v56, %v442_v47 }
 0x250   :  { %v485_v49 = vsel %vm421_vm3, %v2738_v46, 0.0 }
 0x251   :  { %v466_v52 = vmul.f32 1.442695, %v452_v50 }
 0x25c   :  { %v445_v36 = vpop.xlane.xlu2 %444 }
 0x25d   :  { %v453_v44 = vsub.f32 %v417_v60, %v445_v36 }
 0x25f   :  { %v468_v45 = vmul.f32 1.442695, %v453_v44 }
 0x261   :  { %774 = vrot.lane.b32.xlu2 %v2622_v33, %s2441_s18  ;;  %2214 = vpow2.f32 %v468_v45 }
 0x262   :  { %799 = vrot.lane.b32.xlu1 %v2626_v38, %s2440_s3  ;;  %2216 = vpow2.f32 %v466_v52 }
 0x264   :  { %v646_v39 = vpop.permute.xlu2 %645 }
 0x265   :  { %v651_v41 = vsel %vm523_vm2, %v646_v39, 0 }
 0x266   :  { %660 = vmatpush.bf16.msra.mxu2 %v651_v41  ;;  %v667_v0 = vpop.permute.xlu1 %666 }
 0x267   :  { %v2745_v51 = vpop.eup %2214  ;;  %v672_v30 = vsel %vm523_vm2, %v667_v0, 0 }
 0x268   :  { %v491_v54 = vsel %vm421_vm3, %v2745_v51, 0.0  ;;  %v2751_v55 = vpop.eup %2216 }
 0x269   :  { %v488_v57 = vsel %vm421_vm3, %v2751_v55, 0.0 }
 0x26a   :  { %797 = vrot.lane.b32.xlu1 %v2626_v38, %s2441_s18 }
 0x26c   :  { %v777_v1 = vpop.permute.xlu2 %776 }
 0x26d   :  { %v782_v23 = vsel %vm233_vm1, %v777_v1, 0 }
 0x26e   :  { %v754_v9 = vpop.permute.xlu1 %753 }
 0x26f   :  { %v759_v24 = vsel %vm233_vm1, %v754_v9, 0 }
 0x272   :  { %868 = vrot.lane.b32.xlu1 %v2638_v53, %s2440_s3 }
 0x276   :  { %v752_v19 = vpop.permute.xlu1 %751 }
 0x277   :  { %486 = vadd.xlane.f32.xlu0 %v485_v49 }
 0x27a   :  { %866 = vrot.lane.b32.xlu1 %v2638_v53, %s2441_s18 }
 0x27f   :  { %492 = vadd.xlane.f32.xlu0 %v491_v54 }
 0x282   :  { %891 = vrot.lane.b32.xlu1 %v2642_v58, %s2440_s3 }
 0x28a   :  { %489 = vadd.xlane.f32.xlu2 %v488_v57 }
 0x293   :  { %845 = vrot.lane.b32.xlu0 %v2634_v48, %s2440_s3 }
 0x29b   :  { %912 = vrot.lane.b32.xlu0 %v2648_v63, %s2441_s18 }
 0x29e   :  { %v472_v56 = vpop.xlane.xlu0 %471 }
 0x29f   :  { %2218 = vrcp.f32 %v472_v56 }
 0x2a2   :  { %822 = vrot.lane.b32.xlu2 %v2630_v43, %s2440_s3 }
 0x2a5   :  { %v2219_v59 = vpop.eup %2218 }
 0x2a6   :  { %v502_v60 = vmul.f32 %v2219_v59, %v2706_v4 }
 0x2a8   :  { %v510_v61 = vpack.c.bf16 %v502_v60, %v502_v60 }
 0x2aa   :  { %820 = vrot.lane.b32.xlu2 %v2630_v43, %s2441_s18  ;;  %2075 = vmatmul.msk.bf16.vlgmr.msra.gmra.mxu3 %vm421_vm3, %v510_v61 }
 0x2ab   :  { %618 = vmatpush.bf16.msra.mxu3 %v609_v62 }
 0x2ac   :  { %v475_v2 = vpop.xlane.xlu0 %474 }
 0x2ad   :  { %2220 = vrcp.f32 %v475_v2 }
 0x2b2   :  { %843 = vrot.lane.b32.xlu2 %v2634_v48, %s2441_s18 }
 0x2b3   :  { %v2221_v7 = vpop.eup %2220 }
 0x2b4   :  { %v503_v4 = vmul.f32 %v2221_v7, %v2710_v18  ;;  %v478_v8 = vpop.xlane.xlu2 %477 }
 0x2b5   :  { %2222 = vrcp.f32 %v478_v8 }
 0x2b6   :  { %v511_v3 = vpack.c.bf16 %v503_v4, %v503_v4  ;;  %v2167_v4 = vld [vmem:[#allocation6] sm:$0xff] }
 0x2b7   :  { %718 = vmatpush.bf16.msrb.mxu0 %v2167_v4 }
 0x2b8   :  { %2076 = vmatmul.msk.bf16.vlgmr.msrb.gmra.mxu1 %vm421_vm3, %v511_v3 }
 0x2ba   :  { %914 = vrot.lane.b32.xlu2 %v2648_v63, %s2440_s3 }
 0x2bb   :  { %v2223_v12 = vpop.eup %2222 }
 0x2bc   :  { %v504_v13 = vmul.f32 %v2223_v12, %v2714_v27  ;;  %v481_v14 = vpop.xlane.xlu2 %480  ;;  %v484_v27 = vpop.xlane.xlu1 %483 }
 0x2bd   :  { %2224 = vrcp.f32 %v481_v14 }
 0x2be   :  { %v512_v17 = vpack.c.bf16 %v504_v13, %v504_v13  ;;  %2226 = vrcp.f32 %v484_v27 }
 0x2bf   :  { %v625_v22 = vpop.permute.xlu0 %624 }
 0x2c0   :  { %v630_v18 = vsel %vm523_vm2, %v625_v22, 0  ;;  %2077 = vmatmul.msk.bf16.vlgmr.msrb.gmra.mxu2 %vm421_vm3, %v512_v17 }
 0x2c1   :  { %791 = vmatpush.bf16.xpose.msrb.mxu2 %v782_v23  ;;  %639 = vmatpush.bf16.msra.mxu1 %v630_v18 }
 0x2c2   :  { %889 = vrot.lane.b32.xlu2 %v2642_v58, %s2441_s18 }
 0x2c3   :  { %v2225_v25 = vpop.eup %2224 }
 0x2c4   :  { %v505_v26 = vmul.f32 %v2225_v25, %v2718_v31  ;;  %v2227_v34 = vpop.eup %2226  ;;  %v775_v49 = vpop.permute.xlu2 %774 }
 0x2c5   :  { %768 = vmatpush.bf16.xpose.msrb.mxu1 %v759_v24  ;;  %v506_v35 = vmul.f32 %v2227_v34, %v2720_v32 }
 0x2c6   :  { %v513_v29 = vpack.c.bf16 %v505_v26, %v505_v26 }
 0x2c7   :  { %v514_v37 = vpack.c.bf16 %v506_v35, %v506_v35 }
 0x2c8   :  { %2078 = vmatmul.msk.bf16.vlgmr.msrb.gmra.mxu3 %vm421_vm3, %v513_v29 }
 0x2c9   :  { %681 = vmatpush.bf16.msrb.mxu3 %v672_v30 }
 0x2d4   :  { %v800_v36 = vpop.permute.xlu1 %799 }
 0x2d5   :  { %v805_v39 = vsel %vm233_vm1, %v800_v36, 0 }
 0x2d8   :  { %2079 = vmatmul.msk.bf16.vlgmr.msra.gmra.mxu3 %vm421_vm3, %v514_v37 }
 0x2d9   :  { %814 = vmatpush.bf16.xpose.msra.mxu3 %v805_v39 }
 0x2dc   :  { %v798_v40 = vpop.permute.xlu1 %797 }
 0x2e4   :  { %v869_v41 = vpop.permute.xlu1 %868 }
 0x2e5   :  { %v874_v56 = vsel %vm233_vm1, %v869_v41, 0 }
 0x2ea   :  { %v487_v31 = vpop.xlane.xlu0 %486 }
 0x2eb   :  { %2228 = vrcp.f32 %v487_v31 }
 0x2ec   :  { %v867_v50 = vpop.permute.xlu1 %866 }
 0x2f1   :  { %v2229_v42 = vpop.eup %2228 }
 0x2f2   :  { %v507_v44 = vmul.f32 %v2229_v42, %v2738_v46  ;;  %v493_v45 = vpop.xlane.xlu0 %492 }
 0x2f3   :  { %2230 = vrcp.f32 %v493_v45 }
 0x2f4   :  { %v515_v47 = vpack.c.bf16 %v507_v44, %v507_v44  ;;  %v892_v46 = vpop.permute.xlu1 %891 }
 0x2f6   :  { %2080 = vmatmul.msk.bf16.vlgmr.msra.gmra.mxu1 %vm421_vm3, %v515_v47 }
 0x2f9   :  { %v2231_v32 = vpop.eup %2230 }
 0x2fa   :  { %v509_v52 = vmul.f32 %v2231_v32, %v2745_v51  ;;  %v897_v51 = vsel %vm233_vm1, %v892_v46, 0 }
 0x2fc   :  { %v517_v54 = vpack.c.bf16 %v509_v52, %v509_v52 }
 0x2fd   :  { %v490_v57 = vpop.xlane.xlu2 %489 }
 0x2fe   :  { %2232 = vrcp.f32 %v490_v57  ;;  %2082 = vmatmul.msk.bf16.vlgmr.msrb.gmra.mxu3 %vm421_vm3, %v517_v54 }
 0x2ff   :  { %883 = vmatpush.bf16.xpose.msrb.mxu3 %v874_v56 }
 0x304   :  { %v2233_v59 = vpop.eup %2232 }
 0x305   :  { %v508_v60 = vmul.f32 %v2233_v59, %v2751_v55  ;;  %v823_v61 = vpop.permute.xlu2 %822  ;;  %v846_v0 = vpop.permute.xlu0 %845 }
 0x306   :  { %v828_v62 = vsel %vm233_vm1, %v823_v61, 0  ;;  %2091 = vmatmul.msk.bf16.vlgmr.msrb.gmra.mxu1 %vm233_vm1, %v752_v19  ;;  %v851_v2 = vsel %vm233_vm1, %v846_v0, 0 }
 0x307   :  { %v516_v1 = vpack.c.bf16 %v508_v60, %v508_v60  ;;  %837 = vmatpush.bf16.xpose.msra.mxu1 %v828_v62 }
 0x309   :  { %2081 = vmatmul.msk.bf16.vlgmr.msra.gmra.mxu2 %vm421_vm3, %v516_v1 }
 0x30a   :  { %860 = vmatpush.bf16.xpose.msra.mxu2 %v851_v2 }
 0x30d   :  { %v821_v7 = vpop.permute.xlu2 %820  ;;  %v913_v19 = vpop.permute.xlu0 %912 }
 0x30e   :  { %2093 = vmatmul.msk.bf16.vlgmr.msra.gmra.mxu3 %vm233_vm1, %v798_v40 }
 0x30f   :  { %906 = vmatpush.bf16.xpose.msrb.mxu1 %v897_v51 }
 0x315   :  { %v844_v55 = vpop.permute.xlu2 %843 }
 0x316   :  { %2094 = vmatmul.msk.bf16.vlgmr.msra.gmra.mxu1 %vm233_vm1, %v821_v7 }
 0x319   :  { %2092 = vmatmul.msk.bf16.vlgmr.msrb.gmra.mxu2 %vm233_vm1, %v775_v49 }
 0x31d   :  { %v915_v8 = vpop.permute.xlu2 %914 }
 0x31e   :  { %v920_v9 = vsel %vm233_vm1, %v915_v8, 0  ;;  %2096 = vmatmul.msk.bf16.vlgmr.msrb.gmra.mxu3 %vm233_vm1, %v867_v50 }
 0x31f   :  { %929 = vmatpush.bf16.xpose.msrb.mxu2 %v920_v9 }
 0x325   :  { %v890_v3 = vpop.permute.xlu2 %889 }
 0x326   :  { %2097 = vmatmul.msk.bf16.vlgmr.msrb.gmra.mxu1 %vm233_vm1, %v890_v3 }
 0x329   :  { %2095 = vmatmul.msk.bf16.vlgmr.msra.gmra.mxu2 %vm233_vm1, %v844_v55 }
 0x32d   :  { %v536_v12 = vpop.f32.mrf.mxu3 }
 0x335   :  { %v538_v13 = vpop.f32.mrf.mxu3  ;;  %v557_v14 = vpop.f32.mrf.mxu1 }
 0x336   :  { %v687_v17 = vpack.c.bf16 %v557_v14, %v536_v12 }
 0x338   :  { %2087 = vmatmul.msk.bf16.vlgmr.msrb.gmra.mxu0 %vm233_vm1, %v687_v17 }
 0x339   :  { %2098 = vmatmul.msk.bf16.vlgmr.msrb.gmra.mxu2 %vm233_vm1, %v913_v19 }
 0x33d   :  { %v559_v22 = vpop.f32.mrf.mxu1 }
 0x343   :  { %v578_v23 = vpop.f32.mrf.mxu2 }
 0x34b   :  { %v580_v18 = vpop.f32.mrf.mxu2  ;;  %v599_v24 = vpop.f32.mrf.mxu3 }
 0x34c   :  { %v688_v25 = vpack.c.bf16 %v599_v24, %v578_v23 }
 0x34e   :  { %2088 = vmatmul.msk.bf16.gmra.mxu0 %vm233_vm1, %v688_v25 }
 0x353   :  { %v601_v26 = vpop.f32.mrf.mxu3 }
 0x35b   :  { %v620_v27 = vpop.f32.mrf.mxu3 }
 0x363   :  { %v622_v29 = vpop.f32.mrf.mxu3 }
 0x373   :  { %v641_v30 = vpop.f32.mrf.mxu1 }
 0x374   :  { %v689_v34 = vpack.c.bf16 %v641_v30, %v620_v27 }
 0x376   :  { %2089 = vmatmul.msk.bf16.gmra.mxu0 %vm233_vm1, %v689_v34 }
 0x37b   :  { %v643_v35 = vpop.f32.mrf.mxu1 }
 0x381   :  { %v683_v36 = vpop.f32.mrf.mxu3 }
 0x383   :  { %v770_v37 = vpop.f32.mrf.mxu1 }
 0x384   :  { %v935_v39 = vsel %vm421_vm3, %v770_v37, -inf }
 0x385   :  { %936 = vmax.xlane.f32.xlu1 %v935_v39 }
 0x389   :  { %v685_v40 = vpop.f32.mrf.mxu3 }
 0x38b   :  { %v772_v31 = vpop.f32.mrf.mxu1 }
 0x38c   :  { %v662_v41 = vpop.f32.mrf.mxu2 }
 0x38d   :  { %v690_v42 = vpack.c.bf16 %v683_v36, %v662_v41 }
 0x38f   :  { %2090 = vmatmul.msk.bf16.gmra.mxu0 %vm233_vm1, %v690_v42 }
 0x391   :  { %v816_v44 = vpop.f32.mrf.mxu3 }
 0x392   :  { %v941_v45 = vsel %vm421_vm3, %v816_v44, -inf }
 0x393   :  { %v839_v47 = vpop.f32.mrf.mxu1  ;;  %942 = vmax.xlane.f32.xlu2 %v941_v45 }
 0x394   :  { %v664_v49 = vpop.f32.mrf.mxu2  ;;  %v944_v32 = vsel %vm421_vm3, %v839_v47, -inf }
 0x395   :  { %945 = vmax.xlane.f32.xlu1 %v944_v32 }
 0x399   :  { %v818_v50 = vpop.f32.mrf.mxu3 }
 0x39b   :  { %v841_v52 = vpop.f32.mrf.mxu1 }
 0x39c   :  { %v793_v54 = vpop.f32.mrf.mxu2 }
 0x39d   :  { %v938_v57 = vsel %vm421_vm3, %v793_v54, -inf }
 0x39e   :  { %939 = vmax.xlane.f32.xlu0 %v938_v57 }
 0x3a1   :  { %v2813_v56 = vpop.f32.mrf.mxu3 }
 0x3a2   :  { %v950_v61 = vsel %vm421_vm3, %v2813_v56, -inf }
 0x3a3   :  { %v2815_v59 = vpop.f32.mrf.mxu1 }
 0x3a4   :  { %v795_v46 = vpop.f32.mrf.mxu2  ;;  %v953_v60 = vsel %vm421_vm3, %v2815_v59, -inf }
 0x3a5   :  { %954 = vmax.xlane.f32.xlu1 %v953_v60 }
 0x3a6   :  { %951 = vmax.xlane.f32.xlu0 %v950_v61 }
 0x3a9   :  { %v887_v62 = vpop.f32.mrf.mxu3 }
 0x3ab   :  { %v910_v0 = vpop.f32.mrf.mxu1 }
 0x3ac   :  { %v862_v51 = vpop.f32.mrf.mxu2 }
 0x3ad   :  { %v947_v1 = vsel %vm421_vm3, %v862_v51, -inf }
 0x3ae   :  { %948 = vmax.xlane.f32.xlu2 %v947_v1 }
 0x3b4   :  { %v864_v2 = vpop.f32.mrf.mxu2 }
 0x3ba   :  { %1052 = vrot.lane.b32.xlu0 %v2622_v33, %s2442_s22 }
 0x3bc   :  { %v931_v7 = vpop.f32.mrf.mxu2 }
 0x3bd   :  { %v956_v55 = vsel %vm421_vm3, %v931_v7, -inf }
 0x3be   :  { %1094 = vrot.lane.b32.xlu1 %v2630_v43, %s2442_s22  ;;  %957 = vmax.xlane.f32.xlu2 %v956_v55 }
 0x3c4   :  { %v933_v4 = vpop.f32.mrf.mxu2 }
 0x3c6   :  { %1115 = vrot.lane.b32.xlu1 %v2634_v48, %s2442_s22 }
 0x3d6   :  { %1031 = vrot.lane.b32.xlu2 %v2618_v28, %s2442_s22 }
 0x3f8   :  { %v937_v8 = vpop.xlane.xlu1 %936 }
 0x3f9   :  { %v959_v9 = vsub.f32 %v770_v37, %v937_v8 }
 0x3fb   :  { %v967_v3 = vmul.f32 1.442695, %v959_v9 }
 0x3fd   :  { %2234 = vpow2.f32 %v967_v3 }
 0x403   :  { %v2831_v12 = vpop.eup %2234 }
 0x404   :  { %v983_v33 = vsel %vm421_vm3, %v2831_v12, 0.0 }
 0x405   :  { %984 = vadd.xlane.f32.xlu0 %v983_v33 }
 0x406   :  { %v943_v22 = vpop.xlane.xlu2 %942 }
 0x407   :  { %v961_v23 = vsub.f32 %v816_v44, %v943_v22 }
 0x408   :  { %v946_v13 = vpop.xlane.xlu1 %945 }
 0x409   :  { %v962_v17 = vsub.f32 %v839_v47, %v946_v13  ;;  %v971_v24 = vmul.f32 1.442695, %v961_v23 }
 0x40b   :  { %v973_v48 = vmul.f32 1.442695, %v962_v17 }
 0x411   :  { %v940_v43 = vpop.xlane.xlu0 %939 }
 0x412   :  { %v960_v14 = vsub.f32 %v793_v54, %v940_v43 }
 0x414   :  { %v969_v19 = vmul.f32 1.442695, %v960_v14 }
 0x416   :  { %2236 = vpow2.f32 %v969_v19 }
 0x417   :  { %2238 = vpow2.f32 %v973_v48 }
 0x418   :  { %2240 = vpow2.f32 %v971_v24 }
 0x419   :  { %1073 = vrot.lane.b32.xlu0 %v2626_v38, %s2442_s22  ;;  %v952_v29 = vpop.xlane.xlu0 %951  ;;  %v955_v38 = vpop.xlane.xlu1 %954 }
 0x41a   :  { %v964_v42 = vsub.f32 %v2813_v56, %v952_v29  ;;  %v965_v62 = vsub.f32 %v2815_v59, %v955_v38 }
 0x41c   :  { %v2837_v28 = vpop.eup %2236  ;;  %v977_v49 = vmul.f32 1.442695, %v964_v42  ;;  %v979_v0 = vmul.f32 1.442695, %v965_v62 }
 0x41d   :  { %v986_v18 = vsel %vm421_vm3, %v2837_v28, 0.0  ;;  %v2841_v26 = vpop.eup %2238 }
 0x41e   :  { %987 = vadd.xlane.f32.xlu1 %v986_v18  ;;  %v992_v34 = vsel %vm421_vm3, %v2841_v26, 0.0  ;;  %v2845_v35 = vpop.eup %2240 }
 0x41f   :  { %v989_v31 = vsel %vm421_vm3, %v2845_v35, 0.0 }
 0x421   :  { %v949_v25 = vpop.xlane.xlu2 %948 }
 0x422   :  { %v963_v27 = vsub.f32 %v862_v51, %v949_v25 }
 0x424   :  { %v975_v30 = vmul.f32 1.442695, %v963_v27 }
 0x426   :  { %2242 = vpow2.f32 %v975_v30  ;;  %993 = vadd.xlane.f32.xlu1 %v992_v34 }
 0x42c   :  { %v2847_v36 = vpop.eup %2242  ;;  %v1053_v37 = vpop.permute.xlu0 %1052 }
 0x42d   :  { %v1058_v39 = vsel %vm523_vm2, %v1053_v37, 0  ;;  %v995_v40 = vsel %vm421_vm3, %v2847_v36, 0.0 }
 0x42e   :  { %996 = vadd.xlane.f32.xlu2 %v995_v40  ;;  %990 = vadd.xlane.f32.xlu1 %v989_v31  ;;  %v720_v31 = vpop.f32.mrf.mxu0 }
 0x42f   :  { %1067 = vmatpush.bf16.msra.mxu1 %v1058_v39 }
 0x430   :  { %v1095_v41 = vpop.permute.xlu1 %1094 }
 0x431   :  { %v958_v44 = vpop.xlane.xlu2 %957  ;;  %v1100_v57 = vsel %vm523_vm2, %v1095_v41, 0 }
 0x432   :  { %v966_v45 = vsub.f32 %v931_v7, %v958_v44 }
 0x434   :  { %v981_v47 = vmul.f32 1.442695, %v966_v45 }
 0x436   :  { %2244 = vpow2.f32 %v981_v47  ;;  %v722_v44 = vpop.f32.mrf.mxu0 }
 0x437   :  { %2246 = vpow2.f32 %v977_v49  ;;  %v2168_v49 = vld [vmem:[#allocation6 + $0x8] sm:$0xff] }
 0x438   :  { %v1116_v32 = vpop.permute.xlu1 %1115  ;;  %2248 = vpow2.f32 %v979_v0 }
 0x439   :  { %v1121_v50 = vsel %vm523_vm2, %v1116_v32, 0  ;;  %v1032_v52 = vpop.permute.xlu2 %1031 }
 0x43a   :  { %v1037_v54 = vsel %vm523_vm2, %v1032_v52, 0  ;;  %1130 = vmatpush.bf16.msra.mxu0 %v1121_v50 }
 0x43b   :  { %1046 = vmatpush.bf16.msra.mxu3 %v1037_v54 }
 0x43c   :  { %v2245_v46 = vpop.eup %2244 }
 0x43d   :  { %v1004_v56 = vsel %vm421_vm3, %v2245_v46, 0.0  ;;  %v2247_v60 = vpop.eup %2246 }
 0x43e   :  { %1005 = vadd.xlane.f32.xlu2 %v1004_v56  ;;  %v998_v61 = vsel %vm421_vm3, %v2247_v60, 0.0  ;;  %v2249_v51 = vpop.eup %2248  ;;  %1230 = vmatpush.bf16.msrb.mxu0 %v2168_v49  ;;  %v725_v32 = vpop.f32.mrf.mxu0 }
 0x43f   :  { %1109 = vmatpush.bf16.msrb.mxu3 %v1100_v57  ;;  %v1001_v1 = vsel %vm421_vm3, %v2249_v51, 0.0 }
 0x443   :  { %999 = vadd.xlane.f32.xlu0 %v998_v61 }
 0x446   :  { %v727_v50 = vpop.f32.mrf.mxu0 }
 0x447   :  { %1136 = vrot.lane.b32.xlu1 %v2638_v53, %s2442_s22 }
 0x44e   :  { %v730_v52 = vpop.f32.mrf.mxu0 }
 0x456   :  { %1178 = vrot.lane.b32.xlu2 %v2648_v63, %s2442_s22 }
 0x457   :  { %1157 = vrot.lane.b32.xlu0 %v2642_v58, %s2442_s22 }
 0x471   :  { %1002 = vadd.xlane.f32.xlu1 %v1001_v1 }
 0x478   :  { %v985_v2 = vpop.xlane.xlu0 %984 }
 0x479   :  { %2250 = vrcp.f32 %v985_v2 }
 0x47f   :  { %v2251_v7 = vpop.eup %2250 }
 0x480   :  { %v1015_v55 = vmul.f32 %v2251_v7, %v2831_v12 }
 0x482   :  { %v1023_v53 = vpack.c.bf16 %v1015_v55, %v1015_v55 }
 0x484   :  { %2099 = vmatmul.msk.bf16.vlgmr.msra.gmra.mxu3 %vm421_vm3, %v1023_v53 }
 0x48b   :  { %v1074_v63 = vpop.permute.xlu0 %1073 }
 0x48c   :  { %v1079_v4 = vsel %vm523_vm2, %v1074_v63, 0 }
 0x48d   :  { %1088 = vmatpush.bf16.msra.mxu2 %v1079_v4 }
 0x491   :  { %v988_v58 = vpop.xlane.xlu1 %987 }
 0x492   :  { %2252 = vrcp.f32 %v988_v58 }
 0x498   :  { %v2253_v59 = vpop.eup %2252 }
 0x499   :  { %v1016_v8 = vmul.f32 %v2253_v59, %v2837_v28  ;;  %v994_v9 = vpop.xlane.xlu1 %993 }
 0x49a   :  { %2254 = vrcp.f32 %v994_v9 }
 0x49b   :  { %v1024_v3 = vpack.c.bf16 %v1016_v8, %v1016_v8 }
 0x49d   :  { %2100 = vmatmul.msk.bf16.vlgmr.msra.gmra.mxu1 %vm421_vm3, %v1024_v3 }
 0x4a0   :  { %v2255_v33 = vpop.eup %2254 }
 0x4a1   :  { %v1018_v12 = vmul.f32 %v2255_v33, %v2841_v26  ;;  %v997_v13 = vpop.xlane.xlu2 %996  ;;  %v991_v43 = vpop.xlane.xlu1 %990 }
 0x4a2   :  { %2256 = vrcp.f32 %v997_v13  ;;  %v2193_v13 = vld [vmem:[%s3248_s5] ss:$0 sm:$0xff] }
 0x4a3   :  { %v1026_v14 = vpack.c.bf16 %v1018_v12, %v1018_v12  ;;  %2258 = vrcp.f32 %v991_v43  ;;  %v743_v43 = vadd.f32 %v2193_v13, %v720_v31 }
 0x4a5   :  { %2102 = vmatmul.msk.bf16.vlgmr.msrb.gmra.mxu3 %vm421_vm3, %v1026_v14 }
 0x4a8   :  { %v2257_v17 = vpop.eup %2256 }
 0x4a9   :  { %v2259_v19 = vpop.eup %2258  ;;  %v1019_v48 = vmul.f32 %v2257_v17, %v2847_v36 }
 0x4aa   :  { %v1017_v22 = vmul.f32 %v2259_v19, %v2845_v35 }
 0x4ab   :  { %v1027_v28 = vpack.c.bf16 %v1019_v48, %v1019_v48 }
 0x4ac   :  { %v1025_v23 = vpack.c.bf16 %v1017_v22, %v1017_v22  ;;  %v744_v22 = vadd.f32 %v2193_v13, %v722_v44 }
 0x4ad   :  { %2103 = vmatmul.msk.bf16.vlgmr.msra.gmra.mxu0 %vm421_vm3, %v1027_v28 }
 0x4ae   :  { %2101 = vmatmul.msk.bf16.vlgmr.msra.gmra.mxu2 %vm421_vm3, %v1025_v23 }
 0x4b1   :  { %v1006_v18 = vpop.xlane.xlu2 %1005 }
 0x4b2   :  { %2260 = vrcp.f32 %v1006_v18 }
 0x4b6   :  { %v1000_v24 = vpop.xlane.xlu0 %999 }
 0x4b7   :  { %2262 = vrcp.f32 %v1000_v24 }
 0x4b8   :  { %v2261_v25 = vpop.eup %2260 }
 0x4b9   :  { %v1022_v26 = vmul.f32 %v2261_v25, %v2245_v46  ;;  %v1179_v27 = vpop.permute.xlu2 %1178  ;;  %v1137_v29 = vpop.permute.xlu1 %1136  ;;  %v745_v25 = vadd.f32 %v2193_v13, %v725_v32 }
 0x4ba   :  { %v1184_v30 = vsel %vm523_vm2, %v1179_v27, 0  ;;  %v1142_v34 = vsel %vm523_vm2, %v1137_v29, 0  ;;  %v732_v46 = vpop.f32.mrf.mxu0 }
 0x4bb   :  { %v1030_v38 = vpack.c.bf16 %v1022_v26, %v1022_v26  ;;  %1151 = vmatpush.bf16.msrb.mxu1 %v1142_v34  ;;  %1193 = vmatpush.bf16.msra.mxu3 %v1184_v30 }
 0x4bd   :  { %v2263_v35 = vpop.eup %2262 }
 0x4be   :  { %v1020_v36 = vmul.f32 %v2263_v35, %v2247_v60  ;;  %2106 = vmatmul.msk.bf16.vlgmr.msra.gmra.mxu3 %vm421_vm3, %v1030_v38 }
 0x4c0   :  { %v1028_v37 = vpack.c.bf16 %v1020_v36, %v1020_v36 }
 0x4c2   :  { %2104 = vmatmul.msk.bf16.vlgmr.msrb.gmra.mxu1 %vm421_vm3, %v1028_v37  ;;  %v735_v56 = vpop.f32.mrf.mxu0 }
 0x4c9   :  { %v1158_v39 = vpop.permute.xlu0 %1157 }
 0x4ca   :  { %v1163_v40 = vsel %vm523_vm2, %v1158_v39, 0  ;;  %v2886_v62 = vpop.f32.mrf.mxu0 }
 0x4cb   :  { %1172 = vmatpush.bf16.msrb.mxu2 %v1163_v40 }
 0x4e4   :  { %v1003_v41 = vpop.xlane.xlu1 %1002 }
 0x4e5   :  { %2264 = vrcp.f32 %v1003_v41 }
 0x4eb   :  { %v2265_v42 = vpop.eup %2264 }
 0x4ec   :  { %v1021_v45 = vmul.f32 %v2265_v42, %v2249_v51 }
 0x4ee   :  { %v1029_v47 = vpack.c.bf16 %v1021_v45, %v1021_v45 }
 0x4f0   :  { %2105 = vmatmul.msk.bf16.vlgmr.msrb.gmra.mxu2 %vm421_vm3, %v1029_v47 }
 0x507   :  { %v1048_v54 = vpop.f32.mrf.mxu3 }
 0x50f   :  { %v1050_v57 = vpop.f32.mrf.mxu3 }
 0x51a   :  { %v1069_v60 = vpop.f32.mrf.mxu1 }
 0x51b   :  { %v1199_v61 = vpack.c.bf16 %v1069_v60, %v1048_v54 }
 0x51d   :  { %2111 = vmatmul.msk.bf16.vlgmr.msrb.gmra.mxu0 %vm233_vm1, %v1199_v61 }
 0x522   :  { %v1071_v0 = vpop.f32.mrf.mxu1 }
 0x528   :  { %v1111_v51 = vpop.f32.mrf.mxu3 }
 0x52a   :  { %v1132_v1 = vpop.f32.mrf.mxu0 }
 0x530   :  { %v1113_v2 = vpop.f32.mrf.mxu3 }
 0x531   :  { %v1090_v7 = vpop.f32.mrf.mxu2 }
 0x532   :  { %v1200_v55 = vpack.c.bf16 %v1111_v51, %v1090_v7  ;;  %v1134_v53 = vpop.f32.mrf.mxu0 }
 0x534   :  { %2112 = vmatmul.msk.bf16.gmra.mxu0 %vm233_vm1, %v1200_v55 }
 0x539   :  { %v1092_v63 = vpop.f32.mrf.mxu2 }
 0x53f   :  { %v1153_v4 = vpop.f32.mrf.mxu1 }
 0x540   :  { %v1201_v58 = vpack.c.bf16 %v1153_v4, %v1132_v1 }
 0x541   :  { %v1195_v59 = vpop.f32.mrf.mxu3 }
 0x544   :  { %2113 = vmatmul.msk.bf16.gmra.mxu0 %vm233_vm1, %v1201_v58 }
 0x547   :  { %v1155_v8 = vpop.f32.mrf.mxu1 }
 0x549   :  { %v1197_v9 = vpop.f32.mrf.mxu3 }
 0x573   :  { %v1174_v3 = vpop.f32.mrf.mxu2 }
 0x574   :  { %v1202_v33 = vpack.c.bf16 %v1195_v59, %v1174_v3 }
 0x576   :  { %2114 = vmatmul.msk.bf16.gmra.mxu0 %vm233_vm1, %v1202_v33 }
 0x57b   :  { %v1176_v12 = vpop.f32.mrf.mxu2 }
 0x59a   :  { %v1232_v14 = vpop.f32.mrf.mxu0 }
 0x59b   :  { %v1252_v17 = vadd.f32 %v1232_v14, %v743_v43 }
 0x59d   :  { %v1260_v19 = vadd.f32 %v1252_v17, %v2569_v5  ;;  %v746_v5 = vadd.f32 %v2193_v13, %v727_v50 }
 0x59f   :  { %v1270_v48 = vsel %vm177_vm0, %v1260_v19, 0.0 }
 0x5a0   :  { %1271 = vadd.xlane.f32.xlu0 %v1270_v48 }
 0x5a2   :  { %v1234_v28 = vpop.f32.mrf.mxu0 }
 0x5a3   :  { %v1253_v23 = vadd.f32 %v1234_v28, %v744_v22 }
 0x5a5   :  { %v1261_v18 = vadd.f32 %v1253_v23, %v2571_v6  ;;  %v747_v6 = vadd.f32 %v2193_v13, %v730_v52  ;;  %v2443_v52 = vmov 32.0  }
 0x5a6   :  { %2266 = vrcp.f32 %v2443_v52 }
 0x5a7   :  { %v1273_v24 = vsel %vm177_vm0, %v1261_v18, 0.0 }
 0x5a8   :  { %1274 = vadd.xlane.f32.xlu2 %v1273_v24 }
 0x5b1   :  { %v1237_v26 = vpop.f32.mrf.mxu0 }
 0x5b2   :  { %v1254_v27 = vadd.f32 %v1237_v26, %v745_v25 }
 0x5b4   :  { %v1262_v29 = vadd.f32 %v1254_v27, %v2582_v10  ;;  %v748_v10 = vadd.f32 %v2193_v13, %v732_v46 }
 0x5b6   :  { %v1276_v30 = vsel %vm177_vm0, %v1262_v29, 0.0 }
 0x5b7   :  { %1277 = vadd.xlane.f32.xlu1 %v1276_v30 }
 0x5b9   :  { %v1239_v34 = vpop.f32.mrf.mxu0 }
 0x5ba   :  { %v1255_v38 = vadd.f32 %v1239_v34, %v746_v5 }
 0x5bc   :  { %v1263_v35 = vadd.f32 %v1255_v38, %v2584_v11  ;;  %v749_v11 = vadd.f32 %v2193_v13, %v735_v56 }
 0x5be   :  { %v1279_v36 = vsel %vm177_vm0, %v1263_v35, 0.0 }
 0x5bf   :  { %1280 = vadd.xlane.f32.xlu1 %v1279_v36  ;;  %v2170_v36 = vld [vmem:[#allocation7 + $0x8] sm:$0xff] }
 0x5c0   :  { %1517 = vmatpush.bf16.msra.mxu1 %v2170_v36 }
 0x5c1   :  { %v1242_v37 = vpop.f32.mrf.mxu0 }
 0x5c2   :  { %v1256_v39 = vadd.f32 %v1242_v37, %v747_v6 }
 0x5c4   :  { %v1264_v40 = vadd.f32 %v1256_v39, %v2595_v15  ;;  %v2267_v15 = vpop.eup %2266  ;;  %v2169_v39 = vld [vmem:[#allocation7] sm:$0xff] }
 0x5c5   :  { %v1295_v54 = vmul.f32 32.0, %v2267_v15  ;;  %vm1299_vm4 = vweird.f32 %v2267_v15  ;;  %1518 = vmatpush.bf16.msra.mxu1 %v2169_v39 }
 0x5c6   :  { %v1282_v31 = vsel %vm177_vm0, %v1264_v40, 0.0 }
 0x5c7   :  { %1283 = vadd.xlane.f32.xlu1 %v1282_v31  ;;  %v1296_v57 = vsub.f32 1.0, %v1295_v54 }
 0x5c9   :  { %v1244_v41 = vpop.f32.mrf.mxu0  ;;  %v1297_v46 = vmul.f32 %v2267_v15, %v1296_v57 }
 0x5ca   :  { %v1257_v42 = vadd.f32 %v1244_v41, %v748_v10 }
 0x5cb   :  { %v1298_v60 = vadd.f32 %v2267_v15, %v1297_v46 }
 0x5cc   :  { %v1265_v44 = vadd.f32 %v1257_v42, %v2597_v16 }
 0x5cd   :  { %v2908_v16 = vsel %vm1299_vm4, %v2267_v15, %v1298_v60 }
 0x5ce   :  { %v1285_v45 = vsel %vm177_vm0, %v1265_v44, 0.0 }
 0x5cf   :  { %1286 = vadd.xlane.f32.xlu1 %v1285_v45 }
 0x5f3   :  { %v1247_v47 = vpop.f32.mrf.mxu0 }
 0x5f4   :  { %v1258_v49 = vadd.f32 %v1247_v47, %v749_v11 }
 0x5f6   :  { %v1266_v32 = vadd.f32 %v1258_v49, %v2608_v20  ;;  %v750_v20 = vadd.f32 %v2193_v13, %v2886_v62 }
 0x5f8   :  { %v1288_v50 = vsel %vm177_vm0, %v1266_v32, 0.0 }
 0x5f9   :  { %1289 = vadd.xlane.f32.xlu2 %v1288_v50 }
 0x5fb   :  { %v1249_v51 = vpop.f32.mrf.mxu0 }
 0x5fc   :  { %v1259_v2 = vadd.f32 %v1249_v51, %v750_v20 }
 0x5fe   :  { %v1267_v4 = vadd.f32 %v1259_v2, %v2610_v21  ;;  %v2967_v2 = vld [vmem:[%s3249_s6] ss:$0 sm:$0xff] }
 0x600   :  { %v1291_v62 = vsel %vm177_vm0, %v1267_v4, 0.0 }
 0x613   :  { %v1272_v61 = vpop.xlane.xlu0 %1271 }
 0x614   :  { %v1301_v56 = vmul.f32 %v2908_v16, %v1272_v61 }
 0x616   :  { %v2911_v0 = vsub.f32 %v1260_v19, %v1301_v56 }
 0x618   :  { %v1317_v1 = vmul.f32 %v2911_v0, %v2911_v0 }
 0x61a   :  { %v1325_v7 = vsel %vm177_vm0, %v1317_v1, 0.0 }
 0x61b   :  { %v1275_v55 = vpop.xlane.xlu2 %1274  ;;  %1326 = vadd.xlane.f32.xlu0 %v1325_v7 }
 0x61c   :  { %v1302_v53 = vmul.f32 %v2908_v16, %v1275_v55 }
 0x61e   :  { %v2918_v63 = vsub.f32 %v1261_v18, %v1302_v53 }
 0x620   :  { %v1318_v58 = vmul.f32 %v2918_v63, %v2918_v63 }
 0x622   :  { %v1328_v59 = vsel %vm177_vm0, %v1318_v58, 0.0 }
 0x623   :  { %1329 = vadd.xlane.f32.xlu1 %v1328_v59  ;;  %1292 = vadd.xlane.f32.xlu0 %v1291_v62 }
 0x62a   :  { %v1278_v8 = vpop.xlane.xlu1 %1277 }
 0x62b   :  { %v1303_v9 = vmul.f32 %v2908_v16, %v1278_v8 }
 0x62d   :  { %v2926_v3 = vsub.f32 %v1262_v29, %v1303_v9 }
 0x62f   :  { %v1319_v33 = vmul.f32 %v2926_v3, %v2926_v3 }
 0x631   :  { %v1331_v12 = vsel %vm177_vm0, %v1319_v33, 0.0 }
 0x632   :  { %v1281_v21 = vpop.xlane.xlu1 %1280  ;;  %1332 = vadd.xlane.f32.xlu1 %v1331_v12 }
 0x633   :  { %v1304_v13 = vmul.f32 %v2908_v16, %v1281_v21 }
 0x635   :  { %v2932_v43 = vsub.f32 %v1263_v35, %v1304_v13 }
 0x637   :  { %v1320_v14 = vmul.f32 %v2932_v43, %v2932_v43 }
 0x639   :  { %v1334_v17 = vsel %vm177_vm0, %v1320_v14, 0.0 }
 0x63a   :  { %v1284_v19 = vpop.xlane.xlu1 %1283  ;;  %1335 = vadd.xlane.f32.xlu2 %v1334_v17 }
 0x63b   :  { %v1305_v48 = vmul.f32 %v2908_v16, %v1284_v19 }
 0x63d   :  { %v2938_v22 = vsub.f32 %v1264_v40, %v1305_v48 }
 0x63f   :  { %v1321_v28 = vmul.f32 %v2938_v22, %v2938_v22 }
 0x641   :  { %v1337_v23 = vsel %vm177_vm0, %v1321_v28, 0.0 }
 0x642   :  { %v1287_v18 = vpop.xlane.xlu1 %1286  ;;  %1338 = vadd.xlane.f32.xlu0 %v1337_v23 }
 0x643   :  { %v1306_v24 = vmul.f32 %v2908_v16, %v1287_v18 }
 0x645   :  { %v2944_v25 = vsub.f32 %v1265_v44, %v1306_v24 }
 0x647   :  { %v1322_v26 = vmul.f32 %v2944_v25, %v2944_v25 }
 0x649   :  { %v1340_v27 = vsel %vm177_vm0, %v1322_v26, 0.0 }
 0x64a   :  { %1341 = vadd.xlane.f32.xlu1 %v1340_v27 }
 0x66c   :  { %v1290_v29 = vpop.xlane.xlu2 %1289 }
 0x66d   :  { %v1307_v30 = vmul.f32 %v2908_v16, %v1290_v29 }
 0x66f   :  { %v2950_v5 = vsub.f32 %v1266_v32, %v1307_v30 }
 0x671   :  { %v1323_v34 = vmul.f32 %v2950_v5, %v2950_v5 }
 0x673   :  { %v1343_v38 = vsel %vm177_vm0, %v1323_v34, 0.0 }
 0x674   :  { %1344 = vadd.xlane.f32.xlu2 %v1343_v38 }
 0x68e   :  { %v1327_v35 = vpop.xlane.xlu0 %1326 }
 0x68f   :  { %v1349_v6 = vmul.f32 %v1327_v35, %v2908_v16 }
 0x691   :  { %v1357_v37 = vadd.f32 1e-05, %v1349_v6 }
 0x693   :  { %2268 = vrsqrt.f32 %v1357_v37  ;;  %vm1371_vm6 = vweird.f32 %v1357_v37 }
 0x696   :  { %v1330_v40 = vpop.xlane.xlu1 %1329  ;;  %v1293_v31 = vpop.xlane.xlu0 %1292 }
 0x697   :  { %v1350_v10 = vmul.f32 %v1330_v40, %v2908_v16  ;;  %v1308_v41 = vmul.f32 %v2908_v16, %v1293_v31 }
 0x699   :  { %v2269_v42 = vpop.eup %2268  ;;  %v1358_v44 = vadd.f32 1e-05, %v1350_v10  ;;  %v2958_v45 = vsub.f32 %v1267_v4, %v1308_v41  ;;  %v2973_v4 = vld [vmem:[%s3250_s7] ss:$0 sm:$0xff] }
 0x69a   :  { %v1366_v11 = vmul.f32 %v2269_v42, %v1357_v37  ;;  %vm1372_vm5 = vweird.f32 %v2269_v42 }
 0x69b   :  { %2270 = vrsqrt.f32 %v1358_v44  ;;  %v1324_v47 = vmul.f32 %v2958_v45, %v2958_v45  ;;  %vm1373_vm7 = vmor %vm1371_vm6, %vm1372_vm5  ;;  %vm1381_vm9 = vweird.f32 %v1358_v44 }
 0x69c   :  { %v1367_v49 = vmul.f32 %v2269_v42, %v1366_v11 }
 0x69d   :  { %v1346_v32 = vsel %vm177_vm0, %v1324_v47, 0.0 }
 0x69e   :  { %v1368_v50 = vmul.f32 0.5, %v1367_v49  ;;  %1347 = vadd.xlane.f32.xlu0 %v1346_v32 }
 0x6a0   :  { %v1369_v52 = vsub.f32 1.5, %v1368_v50 }
 0x6a1   :  { %v2271_v15 = vpop.eup %2270 }
 0x6a2   :  { %v1370_v54 = vmul.f32 %v2269_v42, %v1369_v52  ;;  %v1376_v57 = vmul.f32 %v2271_v15, %v1358_v44  ;;  %vm1382_vm8 = vweird.f32 %v2271_v15 }
 0x6a3   :  { %vm1383_vm10 = vmor %vm1381_vm9, %vm1382_vm8 }
 0x6a4   :  { %v1377_v46 = vmul.f32 %v2271_v15, %v1376_v57  ;;  %v1374_v61 = vsel %vm1373_vm7, %v2269_v42, %v1370_v54 }
 0x6a5   :  { %v1333_v60 = vpop.xlane.xlu1 %1332  ;;  %v1445_v7 = vmul.f32 %v1374_v61, %v2911_v0 }
 0x6a6   :  { %v1378_v56 = vmul.f32 0.5, %v1377_v46  ;;  %v1351_v51 = vmul.f32 %v1333_v60, %v2908_v16 }
 0x6a7   :  { %v1456_v58 = vmul.f32 %v2967_v2, %v1445_v7 }
 0x6a8   :  { %v1379_v20 = vsub.f32 1.5, %v1378_v56  ;;  %v1359_v1 = vadd.f32 1e-05, %v1351_v51 }
 0x6a9   :  { %v2980_v12 = vadd.f32 %v2973_v4, %v1456_v58 }
 0x6aa   :  { %v1380_v55 = vmul.f32 %v2271_v15, %v1379_v20  ;;  %2272 = vrsqrt.f32 %v1359_v1  ;;  %vm1391_vm12 = vweird.f32 %v1359_v1 }
 0x6ac   :  { %v1384_v53 = vsel %vm1383_vm10, %v2271_v15, %v1380_v55 }
 0x6ad   :  { %v1446_v59 = vmul.f32 %v1384_v53, %v2918_v63  ;;  %v1336_v62 = vpop.xlane.xlu2 %1335 }
 0x6ae   :  { %v1352_v8 = vmul.f32 %v1336_v62, %v2908_v16 }
 0x6af   :  { %v1457_v9 = vmul.f32 %v2967_v2, %v1446_v59 }
 0x6b0   :  { %v2273_v0 = vpop.eup %2272  ;;  %v1360_v33 = vadd.f32 1e-05, %v1352_v8 }
 0x6b1   :  { %v2983_v21 = vadd.f32 %v2973_v4, %v1457_v9  ;;  %v1386_v13 = vmul.f32 %v2273_v0, %v1359_v1  ;;  %vm1392_vm11 = vweird.f32 %v2273_v0 }
 0x6b2   :  { %2274 = vrsqrt.f32 %v1360_v33  ;;  %vm1393_vm13 = vmor %vm1391_vm12, %vm1392_vm11  ;;  %vm1401_vm15 = vweird.f32 %v1360_v33 }
 0x6b3   :  { %v1387_v14 = vmul.f32 %v2273_v0, %v1386_v13  ;;  %v1475_v17 = vpack.c.bf16 %v2983_v21, %v2980_v12 }
 0x6b5   :  { %v1388_v63 = vmul.f32 0.5, %v1387_v14  ;;  %v1339_v19 = vpop.xlane.xlu0 %1338  ;;  %2123 = vmatmul.msk.bf16.vlgmr.msra.gmra.mxu1 %vm177_vm0, %v1475_v17  ;;  %v2173_v17 = vld [vmem:[%s3253_s10 + $0x10] sm:$0xff] }
 0x6b6   :  { %v1353_v48 = vmul.f32 %v1339_v19, %v2908_v16  ;;  %v2172_v19 = vld [vmem:[%s3253_s10 + $0x8] sm:$0xff] }
 0x6b7   :  { %v1389_v28 = vsub.f32 1.5, %v1388_v63 }
 0x6b8   :  { %v2275_v23 = vpop.eup %2274  ;;  %v1361_v18 = vadd.f32 1e-05, %v1353_v48 }
 0x6b9   :  { %v1390_v24 = vmul.f32 %v2273_v0, %v1389_v28  ;;  %v1396_v26 = vmul.f32 %v2275_v23, %v1360_v33  ;;  %vm1402_vm14 = vweird.f32 %v2275_v23  ;;  %v2174_v33 = vld [vmem:[%s3253_s10 + $0x18] sm:$0xff] }
 0x6ba   :  { %2276 = vrsqrt.f32 %v1361_v18  ;;  %vm1403_vm1 = vmor %vm1401_vm15, %vm1402_vm14  ;;  %vm1411_vm3 = vweird.f32 %v1361_v18  ;;  %1605 = vmatpush.bf16.msra.mxu2 %v2174_v33  ;;  %vm1588_vm14 = vcmask 523264  }
 0x6bb   :  { %v1397_v27 = vmul.f32 %v2275_v23, %v1396_v26  ;;  %v1394_v29 = vsel %vm1393_vm13, %v2273_v0, %v1390_v24 }
 0x6bc   :  { %v1447_v6 = vmul.f32 %v1394_v29, %v2926_v3 }
 0x6bd   :  { %v1398_v30 = vmul.f32 0.5, %v1397_v27  ;;  %v1342_v34 = vpop.xlane.xlu1 %1341 }
 0x6be   :  { %v1354_v38 = vmul.f32 %v1342_v34, %v2908_v16  ;;  %v1458_v42 = vmul.f32 %v2967_v2, %v1447_v6  ;;  %1606 = vmatpush.bf16.msra.mxu2 %v2173_v17 }
 0x6bf   :  { %v1399_v35 = vsub.f32 1.5, %v1398_v30 }
 0x6c0   :  { %v2277_v36 = vpop.eup %2276  ;;  %v1362_v37 = vadd.f32 1e-05, %v1354_v38  ;;  %v2995_v32 = vadd.f32 %v2973_v4, %v1458_v42 }
 0x6c1   :  { %v1400_v39 = vmul.f32 %v2275_v23, %v1399_v35  ;;  %v1406_v40 = vmul.f32 %v2277_v36, %v1361_v18  ;;  %vm1412_vm2 = vweird.f32 %v2277_v36  ;;  %v2171_v18 = vld [vmem:[%s3253_s10] sm:$0xff] }
 0x6c2   :  { %2278 = vrsqrt.f32 %v1362_v37  ;;  %vm1413_vm4 = vmor %vm1411_vm3, %vm1412_vm2  ;;  %vm1421_vm6 = vweird.f32 %v1362_v37  ;;  %1607 = vmatpush.bf16.msra.mxu2 %v2172_v19 }
 0x6c3   :  { %v1404_v31 = vsel %vm1403_vm1, %v2275_v23, %v1400_v39  ;;  %v1407_v10 = vmul.f32 %v2277_v36, %v1406_v40 }
 0x6c4   :  { %v1448_v41 = vmul.f32 %v1404_v31, %v2932_v43 }
 0x6c5   :  { %v1408_v44 = vmul.f32 0.5, %v1407_v10 }
 0x6c6   :  { %v1459_v11 = vmul.f32 %v2967_v2, %v1448_v41  ;;  %1608 = vmatpush.bf16.msra.mxu2 %v2171_v18 }
 0x6c7   :  { %v1409_v47 = vsub.f32 1.5, %v1408_v44 }
 0x6c8   :  { %v2279_v49 = vpop.eup %2278  ;;  %v2998_v3 = vadd.f32 %v2973_v4, %v1459_v11 }
 0x6c9   :  { %v1410_v50 = vmul.f32 %v2277_v36, %v1409_v47  ;;  %v1416_v52 = vmul.f32 %v2279_v49, %v1362_v37  ;;  %vm1422_vm5 = vweird.f32 %v2279_v49 }
 0x6ca   :  { %v1476_v15 = vpack.c.bf16 %v2998_v3, %v2995_v32  ;;  %vm1423_vm7 = vmor %vm1421_vm6, %vm1422_vm5 }
 0x6cb   :  { %v1417_v43 = vmul.f32 %v2279_v49, %v1416_v52  ;;  %v1414_v54 = vsel %vm1413_vm4, %v2277_v36, %v1410_v50 }
 0x6cc   :  { %2124 = vmatmul.msk.bf16.gmra.mxu1 %vm177_vm0, %v1476_v15  ;;  %v1449_v60 = vmul.f32 %v1414_v54, %v2938_v22 }
 0x6cd   :  { %v1418_v57 = vmul.f32 0.5, %v1417_v43 }
 0x6ce   :  { %v1460_v20 = vmul.f32 %v2967_v2, %v1449_v60 }
 0x6cf   :  { %v1419_v46 = vsub.f32 1.5, %v1418_v57 }
 0x6d0   :  { %v3008_v7 = vadd.f32 %v2973_v4, %v1460_v20 }
 0x6d1   :  { %v1420_v61 = vmul.f32 %v2279_v49, %v1419_v46 }
 0x6d3   :  { %v1424_v56 = vsel %vm1423_vm7, %v2279_v49, %v1420_v61 }
 0x6d4   :  { %v1450_v51 = vmul.f32 %v1424_v56, %v2944_v25 }
 0x6d6   :  { %v1461_v1 = vmul.f32 %v2967_v2, %v1450_v51 }
 0x6d8   :  { %v3011_v55 = vadd.f32 %v2973_v4, %v1461_v1 }
 0x6da   :  { %v1477_v53 = vpack.c.bf16 %v3011_v55, %v3008_v7 }
 0x6dc   :  { %2125 = vmatmul.msk.bf16.gmra.mxu1 %vm177_vm0, %v1477_v53 }
 0x6e7   :  { %v1345_v22 = vpop.xlane.xlu2 %1344 }
 0x6e8   :  { %v1355_v58 = vmul.f32 %v1345_v22, %v2908_v16 }
 0x6ea   :  { %v1363_v59 = vadd.f32 1e-05, %v1355_v58 }
 0x6ec   :  { %2280 = vrsqrt.f32 %v1363_v59  ;;  %vm1431_vm9 = vweird.f32 %v1363_v59 }
 0x6f2   :  { %v2281_v25 = vpop.eup %2280 }
 0x6f3   :  { %v1426_v62 = vmul.f32 %v2281_v25, %v1363_v59  ;;  %vm1432_vm8 = vweird.f32 %v2281_v25 }
 0x6f4   :  { %vm1433_vm10 = vmor %vm1431_vm9, %vm1432_vm8 }
 0x6f5   :  { %v1427_v8 = vmul.f32 %v2281_v25, %v1426_v62 }
 0x6f7   :  { %v1428_v14 = vmul.f32 0.5, %v1427_v8 }
 0x6f9   :  { %v1429_v63 = vsub.f32 1.5, %v1428_v14 }
 0x6fb   :  { %v1430_v28 = vmul.f32 %v2281_v25, %v1429_v63 }
 0x6fd   :  { %v1434_v26 = vsel %vm1433_vm10, %v2281_v25, %v1430_v28  ;;  %v2197_v25 = vld [vmem:[%s3254_s11] ss:$0 sm:$0xff] }
 0x6fe   :  { %v1451_v30 = vmul.f32 %v1434_v26, %v2950_v5 }
 0x700   :  { %v1462_v36 = vmul.f32 %v2967_v2, %v1451_v30 }
 0x702   :  { %v3035_v37 = vadd.f32 %v2973_v4, %v1462_v36 }
 0x711   :  { %v1348_v9 = vpop.xlane.xlu0 %1347 }
 0x712   :  { %v1356_v0 = vmul.f32 %v1348_v9, %v2908_v16 }
 0x714   :  { %v1364_v13 = vadd.f32 1e-05, %v1356_v0 }
 0x716   :  { %2282 = vrsqrt.f32 %v1364_v13  ;;  %vm1441_vm12 = vweird.f32 %v1364_v13 }
 0x71c   :  { %v2283_v48 = vpop.eup %2282 }
 0x71d   :  { %v1436_v23 = vmul.f32 %v2283_v48, %v1364_v13  ;;  %vm1442_vm11 = vweird.f32 %v2283_v48 }
 0x71e   :  { %vm1443_vm13 = vmor %vm1441_vm12, %vm1442_vm11 }
 0x71f   :  { %v1437_v24 = vmul.f32 %v2283_v48, %v1436_v23 }
 0x721   :  { %v1438_v27 = vmul.f32 0.5, %v1437_v24 }
 0x723   :  { %v1439_v29 = vsub.f32 1.5, %v1438_v27 }
 0x725   :  { %v1440_v34 = vmul.f32 %v2283_v48, %v1439_v29 }
 0x727   :  { %v1444_v38 = vsel %vm1443_vm13, %v2283_v48, %v1440_v34 }
 0x728   :  { %v1452_v35 = vmul.f32 %v1444_v38, %v2958_v45  ;;  %v2196_v45 = vld [vmem:[%s3252_s9] ss:$0 sm:$0xff] }
 0x72a   :  { %v1463_v6 = vmul.f32 %v2967_v2, %v1452_v35 }
 0x72c   :  { %v3038_v39 = vadd.f32 %v2973_v4, %v1463_v6 }
 0x72e   :  { %v1478_v40 = vpack.c.bf16 %v3038_v39, %v3035_v37 }
 0x730   :  { %2126 = vmatmul.msk.bf16.gmra.mxu1 %vm177_vm0, %v1478_v40 }
 0x732   :  { %v1520_v5 = vpop.f32.mrf.mxu1 }
 0x733   :  { %v1521_v31 = vadd.f32 %v2196_v45, %v1520_v5 }
 0x735   :  { %v1540_v2 = vmax.f32 %v1521_v31, 0.0 }
 0x73a   :  { %v1522_v10 = vpop.f32.mrf.mxu1 }
 0x73b   :  { %v1523_v41 = vadd.f32 %v2196_v45, %v1522_v10 }
 0x73d   :  { %v1541_v42 = vmax.f32 %v1523_v41, 0.0 }
 0x73f   :  { %v1548_v44 = vpack.c.bf16 %v1541_v42, %v1540_v2 }
 0x741   :  { %2143 = vmatmul.msk.bf16.vlgmr.msra.gmra.mxu2 %vm1588_vm14, %v1548_v44 }
 0x749   :  { %v1525_v4 = vpop.f32.mrf.mxu1 }
 0x74a   :  { %v1526_v11 = vadd.f32 %v2196_v45, %v1525_v4 }
 0x74c   :  { %v1542_v50 = vmax.f32 %v1526_v11, 0.0 }
 0x751   :  { %v1527_v47 = vpop.f32.mrf.mxu1 }
 0x752   :  { %v1528_v49 = vadd.f32 %v2196_v45, %v1527_v47 }
 0x754   :  { %v1543_v52 = vmax.f32 %v1528_v49, 0.0 }
 0x756   :  { %v1549_v15 = vpack.c.bf16 %v1543_v52, %v1542_v50 }
 0x758   :  { %2144 = vmatmul.msk.bf16.gmra.mxu2 %vm1588_vm14, %v1549_v15 }
 0x759   :  { %v1530_v43 = vpop.f32.mrf.mxu1 }
 0x75a   :  { %v1531_v54 = vadd.f32 %v2196_v45, %v1530_v43 }
 0x75c   :  { %v1544_v60 = vmax.f32 %v1531_v54, 0.0 }
 0x761   :  { %v1532_v57 = vpop.f32.mrf.mxu1 }
 0x762   :  { %v1533_v46 = vadd.f32 %v2196_v45, %v1532_v57 }
 0x764   :  { %v1545_v61 = vmax.f32 %v1533_v46, 0.0 }
 0x766   :  { %v1550_v56 = vpack.c.bf16 %v1545_v61, %v1544_v60 }
 0x768   :  { %2145 = vmatmul.msk.bf16.gmra.mxu2 %vm1588_vm14, %v1550_v56 }
 0x7ad   :  { %v1535_v51 = vpop.f32.mrf.mxu1 }
 0x7ae   :  { %v1536_v20 = vadd.f32 %v2196_v45, %v1535_v51 }
 0x7b0   :  { %v1546_v22 = vmax.f32 %v1536_v20, 0.0 }
 0x7b5   :  { %v1537_v1 = vpop.f32.mrf.mxu1 }
 0x7b6   :  { %v1538_v53 = vadd.f32 %v2196_v45, %v1537_v1 }
 0x7b8   :  { %v1547_v58 = vmax.f32 %v1538_v53, 0.0 }
 0x7ba   :  { %v1551_v59 = vpack.c.bf16 %v1547_v58, %v1546_v22 }
 0x7bc   :  { %2146 = vmatmul.msk.bf16.gmra.mxu2 %vm1588_vm14, %v1551_v59 }
 0x7c4   :  { %v1610_v62 = vpop.f32.mrf.mxu2 }
 0x7c5   :  { %v1611_v8 = vadd.f32 %v2197_v25, %v1610_v62 }
 0x7c7   :  { %v1630_v9 = vadd.f32 %v1611_v8, %v2980_v12 }
 0x7c9   :  { %v1640_v0 = vsel %vm177_vm0, %v1630_v9, 0.0 }
 0x7ca   :  { %1641 = vadd.xlane.f32.xlu1 %v1640_v0 }
 0x7cc   :  { %v1612_v33 = vpop.f32.mrf.mxu2 }
 0x7cd   :  { %v1613_v13 = vadd.f32 %v2197_v25, %v1612_v33 }
 0x7cf   :  { %v1631_v14 = vadd.f32 %v1613_v13, %v2983_v21 }
 0x7d1   :  { %v1643_v17 = vsel %vm177_vm0, %v1631_v14, 0.0 }
 0x7d2   :  { %1644 = vadd.xlane.f32.xlu2 %v1643_v17 }
 0x7db   :  { %v1615_v63 = vpop.f32.mrf.mxu2 }
 0x7dc   :  { %v1616_v19 = vadd.f32 %v2197_v25, %v1615_v63 }
 0x7de   :  { %v1632_v48 = vadd.f32 %v1616_v19, %v2995_v32 }
 0x7e0   :  { %v1646_v28 = vsel %vm177_vm0, %v1632_v48, 0.0 }
 0x7e1   :  { %1647 = vadd.xlane.f32.xlu0 %v1646_v28 }
 0x7e3   :  { %v1617_v23 = vpop.f32.mrf.mxu2 }
 0x7e4   :  { %v1618_v18 = vadd.f32 %v2197_v25, %v1617_v23 }
 0x7e6   :  { %v1633_v12 = vadd.f32 %v1618_v18, %v2998_v3 }
 0x7e8   :  { %v1649_v24 = vsel %vm177_vm0, %v1633_v12, 0.0 }
 0x7e9   :  { %1650 = vadd.xlane.f32.xlu1 %v1649_v24 }
 0x7eb   :  { %v1620_v26 = vpop.f32.mrf.mxu2 }
 0x7ec   :  { %v1621_v27 = vadd.f32 %v2197_v25, %v1620_v26 }
 0x7ee   :  { %v1634_v21 = vadd.f32 %v1621_v27, %v3008_v7 }
 0x7f0   :  { %v1652_v29 = vsel %vm177_vm0, %v1634_v21, 0.0 }
 0x7f1   :  { %1653 = vadd.xlane.f32.xlu2 %v1652_v29 }
 0x7f3   :  { %v1622_v30 = vpop.f32.mrf.mxu2 }
 0x7f4   :  { %v1623_v34 = vadd.f32 %v2197_v25, %v1622_v30 }
 0x7f6   :  { %v1635_v32 = vadd.f32 %v1623_v34, %v3011_v55 }
 0x7f8   :  { %v1655_v38 = vsel %vm177_vm0, %v1635_v32, 0.0 }
 0x7f9   :  { %1656 = vadd.xlane.f32.xlu0 %v1655_v38 }
 0x83d   :  { %v1642_v35 = vpop.xlane.xlu1 %1641 }
 0x83e   :  { %v1664_v3 = vmul.f32 %v1642_v35, %v2908_v16 }
 0x83f   :  { %v1625_v36 = vpop.f32.mrf.mxu2 }
 0x840   :  { %v3066_v6 = vsub.f32 %v1630_v9, %v1664_v3  ;;  %v1626_v40 = vadd.f32 %v2197_v25, %v1625_v36 }
 0x842   :  { %v1680_v7 = vmul.f32 %v3066_v6, %v3066_v6  ;;  %v1636_v5 = vadd.f32 %v1626_v40, %v3035_v37 }
 0x844   :  { %v1688_v45 = vsel %vm177_vm0, %v1680_v7, 0.0  ;;  %v1658_v31 = vsel %vm177_vm0, %v1636_v5, 0.0 }
 0x845   :  { %v1645_v55 = vpop.xlane.xlu2 %1644  ;;  %1689 = vadd.xlane.f32.xlu0 %v1688_v45  ;;  %1659 = vadd.xlane.f32.xlu1 %v1658_v31 }
 0x846   :  { %v1665_v10 = vmul.f32 %v1645_v55, %v2908_v16 }
 0x847   :  { %v1627_v41 = vpop.f32.mrf.mxu2 }
 0x848   :  { %v3074_v2 = vsub.f32 %v1631_v14, %v1665_v10  ;;  %v1628_v42 = vadd.f32 %v2197_v25, %v1627_v41 }
 0x84a   :  { %v1637_v44 = vadd.f32 %v1628_v42, %v3038_v39  ;;  %v1681_v4 = vmul.f32 %v3074_v2, %v3074_v2 }
 0x84c   :  { %v1661_v37 = vsel %vm177_vm0, %v1637_v44, 0.0  ;;  %v1691_v11 = vsel %vm177_vm0, %v1681_v4, 0.0 }
 0x84d   :  { %1662 = vadd.xlane.f32.xlu2 %v1661_v37  ;;  %1692 = vadd.xlane.f32.xlu1 %v1691_v11 }
 0x854   :  { %v1648_v47 = vpop.xlane.xlu0 %1647 }
 0x855   :  { %v1666_v49 = vmul.f32 %v1648_v47, %v2908_v16 }
 0x857   :  { %v3082_v50 = vsub.f32 %v1632_v48, %v1666_v49 }
 0x859   :  { %v1682_v52 = vmul.f32 %v3082_v50, %v3082_v50 }
 0x85b   :  { %v1694_v15 = vsel %vm177_vm0, %v1682_v52, 0.0 }
 0x85c   :  { %v1651_v39 = vpop.xlane.xlu1 %1650  ;;  %1695 = vadd.xlane.f32.xlu2 %v1694_v15 }
 0x85d   :  { %v1667_v43 = vmul.f32 %v1651_v39, %v2908_v16 }
 0x85f   :  { %v3088_v54 = vsub.f32 %v1633_v12, %v1667_v43 }
 0x861   :  { %v1683_v57 = vmul.f32 %v3088_v54, %v3088_v54 }
 0x863   :  { %v1697_v46 = vsel %vm177_vm0, %v1683_v57, 0.0 }
 0x864   :  { %1698 = vadd.xlane.f32.xlu0 %v1697_v46  ;;  %v1654_v60 = vpop.xlane.xlu2 %1653 }
 0x865   :  { %v1668_v61 = vmul.f32 %v1654_v60, %v2908_v16 }
 0x867   :  { %v3094_v56 = vsub.f32 %v1634_v21, %v1668_v61 }
 0x869   :  { %v1684_v51 = vmul.f32 %v3094_v56, %v3094_v56 }
 0x86b   :  { %v1700_v20 = vsel %vm177_vm0, %v1684_v51, 0.0 }
 0x86c   :  { %1701 = vadd.xlane.f32.xlu1 %v1700_v20  ;;  %v1657_v1 = vpop.xlane.xlu0 %1656 }
 0x86d   :  { %v1669_v53 = vmul.f32 %v1657_v1, %v2908_v16 }
 0x86f   :  { %v3100_v22 = vsub.f32 %v1635_v32, %v1669_v53 }
 0x871   :  { %v1685_v58 = vmul.f32 %v3100_v22, %v3100_v22 }
 0x873   :  { %v1703_v59 = vsel %vm177_vm0, %v1685_v58, 0.0 }
 0x874   :  { %1704 = vadd.xlane.f32.xlu2 %v1703_v59 }
 0x8b8   :  { %v1660_v25 = vpop.xlane.xlu1 %1659  ;;  %v1690_v19 = vpop.xlane.xlu0 %1689 }
 0x8b9   :  { %v1670_v62 = vmul.f32 %v1660_v25, %v2908_v16  ;;  %v1712_v23 = vmul.f32 %v1690_v19, %v2908_v16 }
 0x8bb   :  { %v3106_v8 = vsub.f32 %v1636_v5, %v1670_v62  ;;  %v1720_v29 = vadd.f32 1e-05, %v1712_v23 }
 0x8bd   :  { %v1686_v9 = vmul.f32 %v3106_v8, %v3106_v8  ;;  %2284 = vrsqrt.f32 %v1720_v29  ;;  %vm1734_vm2 = vweird.f32 %v1720_v29 }
 0x8bf   :  { %v1706_v0 = vsel %vm177_vm0, %v1686_v9, 0.0 }
 0x8c0   :  { %v1663_v33 = vpop.xlane.xlu2 %1662  ;;  %1707 = vadd.xlane.f32.xlu0 %v1706_v0  ;;  %v1693_v48 = vpop.xlane.xlu1 %1692 }
 0x8c1   :  { %v1671_v13 = vmul.f32 %v1663_v33, %v2908_v16  ;;  %v1713_v12 = vmul.f32 %v1693_v48, %v2908_v16 }
 0x8c3   :  { %v3112_v14 = vsub.f32 %v1637_v44, %v1671_v13  ;;  %v1721_v34 = vadd.f32 1e-05, %v1713_v12  ;;  %v2285_v40 = vpop.eup %2284 }
 0x8c4   :  { %v1729_v41 = vmul.f32 %v2285_v40, %v1720_v29  ;;  %vm1735_vm15 = vweird.f32 %v2285_v40 }
 0x8c5   :  { %v1687_v17 = vmul.f32 %v3112_v14, %v3112_v14  ;;  %2286 = vrsqrt.f32 %v1721_v34  ;;  %vm3143_vm4 = vmor %vm1734_vm2, %vm1735_vm15  ;;  %vm1744_vm5 = vweird.f32 %v1721_v34 }
 0x8c6   :  { %v1730_v47 = vmul.f32 %v2285_v40, %v1729_v41 }
 0x8c7   :  { %v1709_v63 = vsel %vm177_vm0, %v1687_v17, 0.0 }
 0x8c8   :  { %1710 = vadd.xlane.f32.xlu1 %v1709_v63  ;;  %v1731_v57 = vmul.f32 0.5, %v1730_v47 }
 0x8ca   :  { %v1732_v1 = vsub.f32 1.5, %v1731_v57  ;;  %v2176_v57 = vld [vmem:[#allocation9 + $0x8] sm:$0xff] }
 0x8cb   :  { %v2287_v7 = vpop.eup %2286  ;;  %1977 = vmatpush.bf16.msrb.mxu3 %v2176_v57 }
 0x8cc   :  { %v1739_v55 = vmul.f32 %v2287_v7, %v1721_v34  ;;  %vm1745_vm1 = vweird.f32 %v2287_v7  ;;  %v1733_v9 = vmul.f32 %v2285_v40, %v1732_v1  ;;  %v2175_v1 = vld [vmem:[#allocation9] sm:$0xff] }
 0x8cd   :  { %vm3149_vm7 = vmor %vm1744_vm5, %vm1745_vm1 }
 0x8ce   :  { %v1740_v37 = vmul.f32 %v2287_v7, %v1739_v55  ;;  %v1737_v23 = vsel %vm3143_vm4, %v2285_v40, %v1733_v9 }
 0x8cf   :  { %v1696_v28 = vpop.xlane.xlu2 %1695  ;;  %1978 = vmatpush.bf16.msrb.mxu3 %v2175_v1 }
 0x8d0   :  { %v1714_v26 = vmul.f32 %v1696_v28, %v2908_v16  ;;  %v1741_v39 = vmul.f32 0.5, %v1740_v37 }
 0x8d2   :  { %v1722_v38 = vadd.f32 1e-05, %v1714_v26  ;;  %v1742_v51 = vsub.f32 1.5, %v1741_v39 }
 0x8d4   :  { %2288 = vrsqrt.f32 %v1722_v38  ;;  %v1743_v25 = vmul.f32 %v2287_v7, %v1742_v51  ;;  %vm1754_vm8 = vweird.f32 %v1722_v38 }
 0x8d6   :  { %v1747_v19 = vsel %vm3149_vm7, %v2287_v7, %v1743_v25 }
 0x8d7   :  { %v1699_v18 = vpop.xlane.xlu0 %1698 }
 0x8d8   :  { %v1715_v21 = vmul.f32 %v1699_v18, %v2908_v16 }
 0x8da   :  { %v1723_v35 = vadd.f32 1e-05, %v1715_v21  ;;  %v2289_v5 = vpop.eup %2288  ;;  %v1808_v21 = vmul.f32 %v1737_v23, %v3066_v6  ;;  %v3188_v6 = vld [vmem:[%s3256_s13] ss:$0 sm:$0xff] }
 0x8db   :  { %v1749_v42 = vmul.f32 %v2289_v5, %v1722_v38  ;;  %vm1755_vm3 = vweird.f32 %v2289_v5 }
 0x8dc   :  { %2290 = vrsqrt.f32 %v1723_v35  ;;  %vm3157_vm10 = vmor %vm1754_vm8, %vm1755_vm3  ;;  %vm1764_vm11 = vweird.f32 %v1723_v35 }
 0x8dd   :  { %v1750_v49 = vmul.f32 %v2289_v5, %v1749_v42 }
 0x8df   :  { %v1702_v24 = vpop.xlane.xlu1 %1701  ;;  %v1751_v46 = vmul.f32 0.5, %v1750_v49 }
 0x8e0   :  { %v1716_v30 = vmul.f32 %v1702_v24, %v2908_v16  ;;  %v1809_v24 = vmul.f32 %v1747_v19, %v3074_v2 }
 0x8e1   :  { %v1752_v53 = vsub.f32 1.5, %v1751_v46 }
 0x8e2   :  { %v3123_v3 = vadd.f32 1e-05, %v1716_v30  ;;  %v3129_v45 = vpop.eup %2290 }
 0x8e3   :  { %v1759_v44 = vmul.f32 %v3129_v45, %v1723_v35  ;;  %v1753_v0 = vmul.f32 %v2289_v5, %v1752_v53  ;;  %vm1765_vm6 = vweird.f32 %v3129_v45 }
 0x8e4   :  { %2292 = vrsqrt.f32 %v3123_v3  ;;  %vm1766_vm13 = vmor %vm1764_vm11, %vm1765_vm6  ;;  %vm1774_vm14 = vweird.f32 %v3123_v3  ;;  %vm1943_vm11 = vcmask 1042434  }
 0x8e5   :  { %v1760_v52 = vmul.f32 %v3129_v45, %v1759_v44  ;;  %v1757_v18 = vsel %vm3157_vm10, %v2289_v5, %v1753_v0  ;;  %vm1941_vm10 = vcmask 1041409  }
 0x8e6   :  { %v1810_v29 = vmul.f32 %v1757_v18, %v3082_v50 }
 0x8e7   :  { %v1705_v27 = vpop.xlane.xlu2 %1704  ;;  %v1761_v60 = vmul.f32 0.5, %v1760_v52 }
 0x8e8   :  { %v1717_v32 = vmul.f32 %v1705_v27, %v2908_v16  ;;  %v3175_v27 = vld [vmem:[%s3255_s12] ss:$0 sm:$0xff] }
 0x8e9   :  { %v1762_v58 = vsub.f32 1.5, %v1761_v60  ;;  %v1820_v35 = vmul.f32 %v3175_v27, %v1809_v24  ;;  %v1819_v50 = vmul.f32 %v3175_v27, %v1808_v21  ;;  %v1821_v40 = vmul.f32 %v3175_v27, %v1810_v29 }
 0x8ea   :  { %v3125_v36 = vadd.f32 1e-05, %v1717_v32  ;;  %v3131_v31 = vpop.eup %2292 }
 0x8eb   :  { %v1769_v4 = vmul.f32 %v3131_v31, %v3123_v3  ;;  %v1763_v13 = vmul.f32 %v3129_v45, %v1762_v58  ;;  %vm1775_vm9 = vweird.f32 %v3131_v31 }
 0x8ec   :  { %2294 = vrsqrt.f32 %v3125_v36  ;;  %vm1776_vm15 = vmor %vm1774_vm14, %vm1775_vm9  ;;  %vm1784_vm1 = vweird.f32 %v3125_v36  ;;  %vm1949_vm14 = vcmask 1045509  }
 0x8ed   :  { %v1770_v15 = vmul.f32 %v3131_v31, %v1769_v4  ;;  %v1767_v12 = vsel %vm1766_vm13, %v3129_v45, %v1763_v13  ;;  %v1832_v45 = vadd.f32 %v3188_v6, %v1821_v40  ;;  %v2178_v40 = vld [vmem:[%s3259_s16 + $0x8] sm:$0xff]  ;;  %vm1947_vm13 = vcmask 1044484  }
 0x8ee   :  { %v1811_v32 = vmul.f32 %v1767_v12, %v3088_v54  ;;  %2015 = vmatpush.bf16.msra.mxu3 %v2178_v40 }
 0x8ef   :  { %v1771_v61 = vmul.f32 0.5, %v1770_v15  ;;  %v1852_v49 = vsel %vm177_vm0, %v1832_v45, 0.0 }
 0x8f0   :  { %v1822_v54 = vmul.f32 %v3175_v27, %v1811_v32  ;;  %v1853_v60 = vrot.slane %v1852_v49, 4 }
 0x8f1   :  { %v1772_v59 = vsub.f32 1.5, %v1771_v61 }
 0x8f2   :  { %v3133_v10 = vpop.eup %2294  ;;  %v1833_v55 = vadd.f32 %v3188_v6, %v1822_v54  ;;  %v1854_v33 = vadd.f32 %v1853_v60, %v1852_v49 }
 0x8f3   :  { %v1779_v11 = vmul.f32 %v3133_v10, %v3125_v36  ;;  %v1773_v63 = vmul.f32 %v3131_v31, %v1772_v59  ;;  %vm1785_vm12 = vweird.f32 %v3133_v10 }
 0x8f4   :  { %vm1786_vm2 = vmor %vm1784_vm1, %vm1785_vm12  ;;  %v1859_v15 = vsel %vm177_vm0, %v1833_v55, 0.0  ;;  %v1855_v24 = vrot.slane %v1854_v33, 2  ;;  %vm1945_vm12 = vcmask 1043459   ;;  %vm1953_vm1 = vcmask 1047559  }
 0x8f5   :  { %v1780_v43 = vmul.f32 %v3133_v10, %v1779_v11  ;;  %v1777_v26 = vsel %vm1776_vm15, %v3131_v31, %v1773_v63  ;;  %v2444_v11 = vmov 8.0   ;;  %v1860_v51 = vrot.slane %v1859_v15, 4 }
 0x8f6   :  { %v1812_v2 = vmul.f32 %v1777_v26, %v3094_v56  ;;  %v1831_v56 = vadd.f32 %v3188_v6, %v1820_v35  ;;  %vm1951_vm15 = vcmask 1046534  }
 0x8f7   :  { %v1781_v20 = vmul.f32 0.5, %v1780_v43  ;;  %v1861_v13 = vadd.f32 %v1860_v51, %v1859_v15 }
 0x8f8   :  { %v1823_v7 = vmul.f32 %v3175_v27, %v1812_v2  ;;  %v1845_v44 = vsel %vm177_vm0, %v1831_v56, 0.0 }
 0x8f9   :  { %v1782_v62 = vsub.f32 1.5, %v1781_v20  ;;  %v1846_v39 = vrot.slane %v1845_v44, 4  ;;  %v1862_v29 = vrot.slane %v1861_v13, 2 }
 0x8fa   :  { %v1834_v41 = vadd.f32 %v3188_v6, %v1823_v7 }
 0x8fb   :  { %v1783_v28 = vmul.f32 %v3133_v10, %v1782_v62  ;;  %v1847_v59 = vadd.f32 %v1846_v39, %v1845_v44 }
 0x8fd   :  { %v1787_v30 = vsel %vm1786_vm2, %v3133_v10, %v1783_v28  ;;  %v1848_v28 = vrot.slane %v1847_v59, 2  ;;  %vm2022_vm2 = vcmask 15360  }
 0x8fe   :  { %v1813_v3 = vmul.f32 %v1787_v30, %v3100_v22  ;;  %v1830_v22 = vadd.f32 %v3188_v6, %v1819_v50 }
 0x8ff   :  { %v1849_v2 = vadd.f32 %v1848_v28, %v1847_v59 }
 0x900   :  { %v1824_v5 = vmul.f32 %v3175_v27, %v1813_v3  ;;  %v1838_v47 = vsel %vm177_vm0, %v1830_v22, 0.0 }
 0x901   :  { %v1839_v46 = vrot.slane %v1838_v47, 4  ;;  %v1850_v45 = vrot.slane %v1849_v2, 1 }
 0x902   :  { %v1835_v4 = vadd.f32 %v3188_v6, %v1824_v5 }
 0x903   :  { %v1840_v0 = vadd.f32 %v1839_v46, %v1838_v47 }
 0x904   :  { %v1873_v61 = vsel %vm177_vm0, %v1835_v4, 0.0 }
 0x905   :  { %v1874_v25 = vrot.slane %v1873_v61, 4  ;;  %v1841_v21 = vrot.slane %v1840_v0, 2 }
 0x907   :  { %v1875_v23 = vadd.f32 %v1874_v25, %v1873_v61  ;;  %v1842_v54 = vadd.f32 %v1841_v21, %v1840_v0 }
 0x909   :  { %v1876_v35 = vrot.slane %v1875_v23, 2  ;;  %v1843_v44 = vrot.slane %v1842_v54, 1 }
 0x90b   :  { %v1844_v57 = vadd.f32 %v1843_v44, %v1842_v54 }
 0x933   :  { %v1708_v34 = vpop.xlane.xlu0 %1707 }
 0x934   :  { %v1718_v38 = vmul.f32 %v1708_v34, %v2908_v16 }
 0x936   :  { %v1726_v36 = vadd.f32 1e-05, %v1718_v38 }
 0x938   :  { %2296 = vrsqrt.f32 %v1726_v36  ;;  %vm1794_vm4 = vweird.f32 %v1726_v36 }
 0x939   :  { %2298 = vrcp.f32 %v2444_v11 }
 0x93b   :  { %v1711_v31 = vpop.xlane.xlu1 %1710 }
 0x93c   :  { %v1719_v10 = vmul.f32 %v1711_v31, %v2908_v16  ;;  %v1866_v16 = vsel %vm177_vm0, %v1834_v41, 0.0  ;;  %v1877_v31 = vadd.f32 %v1876_v35, %v1875_v23 }
 0x93d   :  { %v1867_v53 = vrot.slane %v1866_v16, 4 }
 0x93e   :  { %v2297_v42 = vpop.eup %2296  ;;  %v1727_v37 = vadd.f32 1e-05, %v1719_v10  ;;  %v1878_v15 = vrot.slane %v1877_v31, 1 }
 0x93f   :  { %v1789_v52 = vmul.f32 %v2297_v42, %v1726_v36  ;;  %v3208_v58 = vpop.eup %2298  ;;  %vm1795_vm3 = vweird.f32 %v2297_v42  ;;  %v1868_v48 = vadd.f32 %v1867_v53, %v1866_v16  ;;  %v1856_v36 = vadd.f32 %v1855_v24, %v1854_v33 }
 0x940   :  { %2300 = vrsqrt.f32 %v1727_v37  ;;  %v1895_v19 = vmul.f32 8.0, %v3208_v58  ;;  %vm1796_vm5 = vmor %vm1794_vm4, %vm1795_vm3  ;;  %vm1804_vm7 = vweird.f32 %v1727_v37  ;;  %vm1899_vm9 = vweird.f32 %v3208_v58 }
 0x941   :  { %v1790_v43 = vmul.f32 %v2297_v42, %v1789_v52  ;;  %v1869_v32 = vrot.slane %v1868_v48, 2  ;;  %v1857_v41 = vrot.slane %v1856_v36, 1  ;;  %v1851_v52 = vadd.f32 %v1850_v45, %v1849_v2  ;;  %v2177_v45 = vld [vmem:[%s3259_s16] sm:$0xff] }
 0x942   :  { %v1896_v34 = vsub.f32 1.0, %v1895_v19  ;;  %v1879_v1 = vadd.f32 %v1878_v15, %v1877_v31  ;;  %2016 = vmatpush.bf16.msra.mxu3 %v2177_v45  ;;  %v2200_v31 = vld [vmem:[%s3258_s15] ss:$0 sm:$0xff] }
 0x943   :  { %v1791_v20 = vmul.f32 0.5, %v1790_v43  ;;  %v1870_v5 = vadd.f32 %v1869_v32, %v1868_v48  ;;  %v1858_v16 = vadd.f32 %v1857_v41, %v1856_v36 }
 0x944   :  { %v1897_v56 = vmul.f32 %v3208_v58, %v1896_v34 }
 0x945   :  { %v1792_v62 = vsub.f32 1.5, %v1791_v20 }
 0x946   :  { %v2301_v9 = vpop.eup %2300  ;;  %v1898_v47 = vadd.f32 %v3208_v58, %v1897_v56 }
 0x947   :  { %v1793_v17 = vmul.f32 %v2297_v42, %v1792_v62  ;;  %v1799_v63 = vmul.f32 %v2301_v9, %v1727_v37  ;;  %vm1805_vm6 = vweird.f32 %v2301_v9  ;;  %v1871_v37 = vrot.slane %v1870_v5, 1 }
 0x948   :  { %vm1806_vm8 = vmor %vm1804_vm7, %vm1805_vm6 }
 0x949   :  { %v1797_v18 = vsel %vm1796_vm5, %v2297_v42, %v1793_v17  ;;  %v1800_v12 = vmul.f32 %v2301_v9, %v1799_v63  ;;  %v1872_v61 = vadd.f32 %v1871_v37, %v1870_v5 }
 0x94a   :  { %v1814_v26 = vmul.f32 %v1797_v18, %v3106_v8  ;;  %v1863_v8 = vadd.f32 %v1862_v29, %v1861_v13 }
 0x94b   :  { %v1801_v30 = vmul.f32 0.5, %v1800_v12 }
 0x94c   :  { %v1825_v38 = vmul.f32 %v3175_v27, %v1814_v26  ;;  %v1864_v4 = vrot.slane %v1863_v8, 1 }
 0x94d   :  { %v1802_v3 = vsub.f32 1.5, %v1801_v30 }
 0x94e   :  { %v1836_v50 = vadd.f32 %v3188_v6, %v1825_v38  ;;  %v1865_v46 = vadd.f32 %v1864_v4, %v1863_v8  ;;  %v2201_v4 = vld [vmem:[%s3260_s17] ss:$0 sm:$0xff]  ;;  %s3276_s17 = sld [smem:[#allocation16_spill]] }
 0x94f   :  { %v1803_v7 = vmul.f32 %v2301_v9, %v1802_v3 }
 0x950   :  { %v1880_v22 = vsel %vm177_vm0, %v1836_v50, 0.0 }
 0x951   :  { %v1881_v55 = vrot.slane %v1880_v22, 4  ;;  %v1807_v10 = vsel %vm1806_vm8, %v2301_v9, %v1803_v7 }
 0x952   :  { %v1815_v42 = vmul.f32 %v1807_v10, %v3112_v14  ;;  %v1900_v14 = vsel %vm1899_vm9, %v3208_v58, %v1898_v47 }
 0x953   :  { %v1882_v11 = vadd.f32 %v1881_v55, %v1880_v22  ;;  %v1902_v20 = vmul.f32 %v1900_v14, %v1851_v52  ;;  %v1903_v59 = vmul.f32 %v1900_v14, %v1858_v16  ;;  %v1901_v25 = vmul.f32 %v1900_v14, %v1844_v57 }
 0x954   :  { %v1826_v49 = vmul.f32 %v3175_v27, %v1815_v42  ;;  %v1904_v62 = vmul.f32 %v1900_v14, %v1865_v46  ;;  %v1905_v33 = vmul.f32 %v1900_v14, %v1872_v61  ;;  %v1906_v17 = vmul.f32 %v1900_v14, %v1879_v1 }
 0x955   :  { %v1883_v39 = vrot.slane %v1882_v11, 2  ;;  %v1910_v13 = vpack.c.bf16 %v1902_v20, %v1902_v20  ;;  %v1911_v63 = vpack.c.bf16 %v1903_v59, %v1903_v59  ;;  %v1909_v48 = vpack.c.bf16 %v1901_v25, %v1901_v25 }
 0x956   :  { %v1837_v43 = vadd.f32 %v3188_v6, %v1826_v49  ;;  %v1912_v58 = vpack.c.bf16 %v1904_v62, %v1904_v62  ;;  %v1913_v23 = vpack.c.bf16 %v1905_v33, %v1905_v33  ;;  %v1914_v24 = vpack.c.bf16 %v1906_v17, %v1906_v17 }
 0x957   :  { %v1884_v60 = vadd.f32 %v1883_v39, %v1882_v11  ;;  %v1934_v18 = vunpack.c.l.b16 %v1910_v13  ;;  %v1935_v26 = vunpack.c.l.b16 %v1911_v63  ;;  %v1933_v29 = vunpack.c.l.b16 %v1909_v48 }
 0x958   :  { %v1887_v51 = vsel %vm177_vm0, %v1837_v43, 0.0  ;;  %v1936_v30 = vunpack.c.l.b16 %v1912_v58  ;;  %v1937_v32 = vunpack.c.l.b16 %v1913_v23  ;;  %v1938_v2 = vunpack.c.l.b16 %v1914_v24 }
 0x959   :  { %v1885_v53 = vrot.slane %v1884_v60, 1  ;;  %v1888_v27 = vrot.slane %v1887_v51, 4  ;;  %v1942_v35 = vsel %vm1941_vm10, %v1934_v18, %v1933_v29 }
 0x95a   :  { %v1944_v36 = vsel %vm1943_vm11, %v1935_v26, %v1942_v35 }
 0x95b   :  { %v1886_v9 = vadd.f32 %v1885_v53, %v1884_v60  ;;  %v1889_v0 = vadd.f32 %v1888_v27, %v1887_v51  ;;  %v1946_v40 = vsel %vm1945_vm12, %v1936_v30, %v1944_v36 }
 0x95c   :  { %v1948_v54 = vsel %vm1947_vm13, %v1937_v32, %v1946_v40 }
 0x95d   :  { %v1890_v6 = vrot.slane %v1889_v0, 2  ;;  %v1907_v19 = vmul.f32 %v1900_v14, %v1886_v9  ;;  %v1950_v7 = vsel %vm1949_vm14, %v1938_v2, %v1948_v54 }
 0x95f   :  { %v1891_v28 = vadd.f32 %v1890_v6, %v1889_v0  ;;  %v1915_v21 = vpack.c.bf16 %v1907_v19, %v1907_v19 }
 0x961   :  { %v1892_v12 = vrot.slane %v1891_v28, 1  ;;  %v1939_v3 = vunpack.c.l.b16 %v1915_v21 }
 0x963   :  { %v1893_v34 = vadd.f32 %v1892_v12, %v1891_v28  ;;  %v1952_v56 = vsel %vm1951_vm15, %v1939_v3, %v1950_v7 }
 0x965   :  { %v1908_v38 = vmul.f32 %v1900_v14, %v1893_v34 }
 0x967   :  { %v1916_v50 = vpack.c.bf16 %v1908_v38, %v1908_v38 }
 0x969   :  { %v1940_v8 = vunpack.c.l.b16 %v1916_v50 }
 0x96b   :  { %v1954_v5 = vsel %vm1953_vm1, %v1940_v8, %v1952_v56 }
 0x96c   :  { %v1955_v22 = vpack.c.b16 %v1954_v5, %v1954_v5 }
 0x96e   :  { %2155 = vmatmul.msk.bf16.vlgmr.msrb.gmra.mxu3 %vm177_vm0, %v1955_v22 }
 0x9f1   :  { %v1980_v55 = vpop.f32.mrf.mxu3 }
 0x9f2   :  { %v1981_v10 = vadd.f32 %v2200_v31, %v1980_v55 }
 0x9f4   :  { %v1984_v41 = vmax.f32 %v1981_v10, 0.0 }
 0x9f6   :  { %v1985_v42 = vpack.c.bf16 %v1984_v41, %v1984_v41 }
 0x9f8   :  { %2164 = vmatmul.msk.bf16.vlgmr.msra.gmra.mxu3 %vm177_vm0, %v1985_v42 }
 0x9f9   :  { %v1982_v44 = vpop.f32.mrf.mxu3 }
 0xa7b   :  { %v2018_v11 = vpop.f32.mrf.mxu3 }
 0xa7c   :  { %v2019_v47 = vadd.f32 %v2201_v4, %v2018_v11 }
 0xa7e   :  { %v2023_v37 = vsel %vm2022_vm2, %v2019_v47, -inf }
 0xa7f   :  { %2024 = vmax.xlane.f32.xlu2 %v2023_v37 }
 0xa83   :  { %v2020_v49 = vpop.f32.mrf.mxu3 }
 0xaf2   :  { %v2025_v52 = vpop.xlane.xlu2 %2024 }
 0xaf3   :  { %v2026_v15 = vsub.f32 %v2019_v47, %v2025_v52 }
 0xaf5   :  { %v2027_v39 = vmul.f32 1.442695, %v2026_v15 }
 0xaf7   :  { %2302 = vpow2.f32 %v2027_v39 }
 0xafd   :  { %v2303_v16 = vpop.eup %2302 }
 0xafe   :  { %v2029_v43 = vsel %vm2022_vm2, %v2303_v16, 0.0 }
 0xaff   :  { %2030 = vadd.xlane.f32.xlu0 %v2029_v43 }
 0xb72   :  { %v2031_v57 = vpop.xlane.xlu0 %2030 }
 0xb73   :  { %2304 = vrcp.f32 %v2031_v57  ;;  %v2043_v61 = vand.u32 2147483648, %v2031_v57  ;;  %v2041_v20 = vand.u32 2147483647, %v2031_v57  ;;  %vm2037_vm3 = vweird.f32 %v2031_v57 }
 0xb75   :  { %v2044_v53 = vor.u32 1.1754944e-38, %v2043_v61  ;;  %vm2042_vm5 = vcmp.eq.f32.partialorder %v2041_v20, 8.507059e+37 }
 0xb79   :  { %v2305_v46 = vpop.eup %2304 }
 0xb7a   :  { %v2033_v60 = vmul.f32 %v2305_v46, %v2031_v57  ;;  %vm2038_vm0 = vweird.f32 %v2305_v46 }
 0xb7b   :  { %vm2039_vm4 = vmor %vm2037_vm3, %vm2038_vm0 }
 0xb7c   :  { %v2034_v14 = vsub.f32 1.0, %v2033_v60 }
 0xb7e   :  { %v2035_v51 = vmul.f32 %v2305_v46, %v2034_v14 }
 0xb80   :  { %v2036_v1 = vadd.f32 %v2305_v46, %v2035_v51 }
 0xb82   :  { %v2040_v27 = vsel %vm2039_vm4, %v2305_v46, %v2036_v1 }
 0xb83   :  { %v2045_v59 = vsel %vm2042_vm5, %v2044_v53, %v2040_v27 }
 0xb84   :  { %v2046_v25 = vmul.f32 %v2303_v16, %v2045_v59 }
 0xb86   :  { %2047 = vst.msk [vmem:[%s3276_s17] sm:$0xff] %vm2022_vm2, %v2046_v25 }
 0xb87   :  { %2052 = vsyncpa [#allocation3], 1 }
 0xb88   :  { %2053 = vsyncpa [#allocation5], 1 }
 0xb89   :  { %2054 = vsyncpa [#allocation8], 1 }

</bundles_post_ra>
